<compile_context>
chip_gen: v5e
topology: v5e:2x2
jax: 0.10.0
libtpu: 0.0.40
codegen_flags: <defaults>
</compile_context>

<pallas_src>
import functools

import jax
import jax.numpy as jnp
import numpy as np
from jax.experimental import pallas as pl
from jax.experimental.pallas import tpu as pltpu


def _fused_conv(x_ref, weff_ref, beff_ref, *, C, O, K, W, Ho, Wo):
  """Fused (depthwise+pointwise) conv + ReLU for one image.

  x_ref:    (1, C, H*W + K-1)  flattened, zero-padded image (VMEM block)
  weff_ref: (O, C*K*K) f32     effective weights            (VMEM)
  beff_ref: (O, 1)     f32     effective bias               (VMEM)
  returns:  (O, Ho*W) f32 post-ReLU slab; columns with (p % W) >= Wo are junk.
  """
  del Wo  # junk columns handled by callers (mask / wrapper trim)
  KK = K * K
  span = Ho * W
  HWp = x_ref.shape[2]
  w_all = weff_ref[...]                                       # (O, C*KK), 1 vreg

  partials = []
  for c in range(C):
    # Input channel c, broadcast across the O output-channel sublanes once.
    x_c = x_ref[0, c:c + 1, :].astype(jnp.float32)            # (1, HWp)
    x_cb = jnp.broadcast_to(x_c, (O, HWp))                    # (O, HWp)
    acc_c = None
    for kh in range(K):
      for kw in range(K):
        off = kh * W + kw                                     # static lane offset
        idx = c * KK + kh * K + kw
        term = x_cb[:, off:off + span] * w_all[:, idx:idx + 1]
        acc_c = term if acc_c is None else acc_c + term
    partials.append(acc_c)                                    # (O, span)

  acc = partials[0]
  for p in partials[1:]:
    acc = acc + p
  acc = acc + beff_ref[...]                                   # (O,1) bias bcast
  return jnp.maximum(acc, 0.0)                                # ReLU


def _stats_kernel(x_ref, weff_ref, beff_ref, valid_ref, stats_ref,
                  *, C, O, K, W, Ho, Wo):
  """Pass 1: per-image BN partials only (no activation round trip to HBM)."""
  y = _fused_conv(x_ref, weff_ref, beff_ref, C=C, O=O, K=K, W=W, Ho=Ho, Wo=Wo)
  ym = y * valid_ref[...]                                     # zero junk columns
  stats_ref[0] = jnp.concatenate(
      [jnp.sum(ym, axis=1, keepdims=True),                    # (O, 1) sum
       jnp.sum(ym * ym, axis=1, keepdims=True)],              # (O, 1) sum of squares
      axis=1)                                                 # (O, 2)


def _apply_kernel(x_ref, weff_ref, beff_ref, scale_ref, shift_ref, out_ref,
                  *, C, O, K, W, Ho, Wo):
  """Pass 2: recompute fused conv and apply folded BatchNorm affine."""
  y = _fused_conv(x_ref, weff_ref, beff_ref, C=C, O=O, K=K, W=W, Ho=Ho, Wo=Wo)
  out_ref[0] = (y * scale_ref[...] + shift_ref[...]).astype(out_ref.dtype)


def sepconv_forward(x_nchw, w_dw, b_dw, w_pw, gamma, beta, *,
                    kernel_size, depth_multiplier, eps=1e-5):
  """x_nchw: (N, C, H, W) like PyTorch. Returns (N, O, Ho, Wo)."""
  N, C, H, W = x_nchw.shape
  K = kernel_size
  Dm = depth_multiplier
  M = C * Dm
  O = w_pw.shape[0]
  KK = K * K
  Ho, Wo = H - K + 1, W - K + 1
  span = Ho * W                  # full-width output rows (junk cols w >= Wo)
  HWp = H * W + (K - 1)          # padded flat length so every tap slice is in range

  # ---- fold depthwise(KxK, groups=C) + pointwise(1x1) into effective weights
  wdw = w_dw[:, 0, :, :].reshape(C, Dm, KK).astype(jnp.float32)       # (C, Dm, KK)
  wpw = w_pw[:, :, 0, 0].astype(jnp.float32)                          # (O, M)
  wpw_g = wpw.reshape(O, C, Dm)
  weff = jnp.sum(wpw_g[:, :, :, None] * wdw[None, :, :, :], axis=2)   # (O, C, KK)
  weff = weff.reshape(O, C * KK)
  beff = jnp.sum(wpw * b_dw.astype(jnp.float32)[None, :], axis=1,
                 keepdims=True)                                       # (O, 1)

  # ---- lane-dense input: flatten H*W onto lanes, pad K-1 zeros at the end
  x_flat = x_nchw.reshape(N, C, H * W)
  x_pad = jnp.pad(x_flat, ((0, 0), (0, 0), (0, K - 1)))               # (N, C, HWp)
  valid = (jnp.arange(span, dtype=jnp.int32) % W < Wo
           ).astype(jnp.float32)[None, :]                             # (1, span)

  cparams = pltpu.CompilerParams(dimension_semantics=("parallel",),
                                 vmem_limit_bytes=32 * 1024 * 1024)
  kern_kw = dict(C=C, O=O, K=K, W=W, Ho=Ho, Wo=Wo)

  # ---- pass 1: per-image (sum, sum_sq) BN partials (tiny output) ----------
  stats = pl.pallas_call(
      functools.partial(_stats_kernel, **kern_kw),
      grid=(N,),
      in_specs=[
          pl.BlockSpec((1, C, HWp), lambda n: (n, 0, 0)),
          pl.BlockSpec((O, C * KK), lambda n: (0, 0)),
          pl.BlockSpec((O, 1), lambda n: (0, 0)),
          pl.BlockSpec((1, span), lambda n: (0, 0)),
      ],
      out_specs=pl.BlockSpec((1, O, 2), lambda n: (n, 0, 0)),
      out_shape=jax.ShapeDtypeStruct((N, O, 2), jnp.float32),
      compiler_params=cparams,
  )(x_pad, weff, beff, valid)

  # ---- combine batch statistics, fold into per-channel (scale, shift) -----
  count = jnp.float32(N * Ho * Wo)
  tot = jnp.sum(stats, axis=0)                                        # (O, 2)
  mean = tot[:, 0] / count
  # Clamp: E[y^2] - mean^2 can go slightly negative from f32 cancellation.
  var = jnp.maximum(tot[:, 1] / count - mean * mean, 0.0)
  inv = jax.lax.rsqrt(var + eps)
  scale_1d = gamma.astype(jnp.float32) * inv                          # (O,)
  shift_1d = beta.astype(jnp.float32) - mean * scale_1d               # (O,)
  scale2 = scale_1d[:, None]                                          # (O, 1)
  shift2 = shift_1d[:, None]                                          # (O, 1)

  # ---- pass 2: recompute fused conv + folded BN, single HBM output write --
  y_full = pl.pallas_call(
      functools.partial(_apply_kernel, **kern_kw),
      grid=(N,),
      in_specs=[
          pl.BlockSpec((1, C, HWp), lambda n: (n, 0, 0)),
          pl.BlockSpec((O, C * KK), lambda n: (0, 0)),
          pl.BlockSpec((O, 1), lambda n: (0, 0)),
          pl.BlockSpec((O, 1), lambda n: (0, 0)),
          pl.BlockSpec((O, 1), lambda n: (0, 0)),
      ],
      out_specs=pl.BlockSpec((1, O, span), lambda n: (n, 0, 0)),
      out_shape=jax.ShapeDtypeStruct((N, O, span), x_nchw.dtype),
      compiler_params=cparams,
  )(x_pad, weff, beff, scale2, shift2)

  # Trim junk columns (w >= Wo) in the wrapper (trivial XLA slice).
  return y_full.reshape(N, O, Ho, W)[..., :Wo]


def _reference(x_nchw, w_dw, b_dw, w_pw, gamma, beta, *, C, eps):
  dw = jax.lax.conv_general_dilated(
      x_nchw, w_dw, window_strides=(1, 1), padding='VALID',
      feature_group_count=C,
      dimension_numbers=('NCHW', 'OIHW', 'NCHW'),
      precision=jax.lax.Precision.HIGHEST)
  dw = dw + b_dw[None, :, None, None]
  pw = jax.lax.conv_general_dilated(
      dw, w_pw, window_strides=(1, 1), padding='VALID',
      dimension_numbers=('NCHW', 'OIHW', 'NCHW'),
      precision=jax.lax.Precision.HIGHEST)
  y = jnp.maximum(pw, 0.0)
  mean = jnp.mean(y, axis=(0, 2, 3), keepdims=True)
  var = jnp.mean((y - mean) ** 2, axis=(0, 2, 3), keepdims=True)
  return (y - mean) / jnp.sqrt(var + eps) * gamma[None, :, None, None] \
      + beta[None, :, None, None]


if __name__ == "__main__":
  # Module config: SepConv(in_channels=4, out_channels=8, kernel_size=3,
  #                        depth_multiplier=2, with_bn=True, activation=True)
  C, O, K, Dm = 4, 8, 3, 2
  M = C * Dm
  N, H, W = 2, 16, 16

  key = jax.random.PRNGKey(0)
  k_x, k_wdw, k_bdw, k_wpw, k_g, k_b = jax.random.split(key, 6)

  x = jax.random.normal(k_x, (N, C, H, W), jnp.float32)
  # synthetic parameters (shapes match nn.Conv2d / nn.BatchNorm2d)
  w_dw = jax.random.normal(k_wdw, (M, 1, K, K), jnp.float32) * 0.2
  b_dw = jax.random.normal(k_bdw, (M,), jnp.float32) * 0.1
  w_pw = jax.random.normal(k_wpw, (O, M, 1, 1), jnp.float32) * 0.2
  # pointwise conv has bias=not with_bn -> with_bn=True means no bias
  gamma = 1.0 + 0.1 * jax.random.normal(k_g, (O,), jnp.float32)
  beta = 0.1 * jax.random.normal(k_b, (O,), jnp.float32)

  fwd = jax.jit(functools.partial(sepconv_forward,
                                  kernel_size=K, depth_multiplier=Dm))
  out = fwd(x, w_dw, b_dw, w_pw, gamma, beta)
  out = jax.block_until_ready(out)

  ref = _reference(x, w_dw, b_dw, w_pw, gamma, beta, C=C, eps=1e-5)
  np.testing.assert_allclose(np.asarray(out), np.asarray(ref),
                             rtol=5e-3, atol=5e-3)

  print("KERNEL_OK")
</pallas_src>

<mosaic_0001>
module attributes {stable_mosaic.version = 11 : i64} {
  func.func @_apply_kernel(%arg0: i32, %arg1: memref<1x4x258xf32, #tpu.memory_space<vmem>>, %arg2: memref<8x36xf32, #tpu.memory_space<vmem>>, %arg3: memref<8x1xf32, #tpu.memory_space<vmem>>, %arg4: memref<8x1xf32, #tpu.memory_space<vmem>>, %arg5: memref<8x1xf32, #tpu.memory_space<vmem>>, %arg6: memref<1x8x224xf32, #tpu.memory_space<vmem>>) attributes {dimension_semantics = [#tpu.dimension_semantics<parallel>], iteration_bounds = array<i64: 2>, scalar_prefetch = 0 : i64, scratch_operands = 0 : i64, tpu.core_type = #tpu.core_type<tc>, window_params = [{transform_indices = @transform_0, window_bounds = array<i64: 1, 4, 258>}, {pipeline_mode = #tpu.pipeline_mode<synchronous>, transform_indices = @transform_1, window_bounds = array<i64: 8, 36>}, {pipeline_mode = #tpu.pipeline_mode<synchronous>, transform_indices = @transform_2, window_bounds = array<i64: 8, 1>}, {pipeline_mode = #tpu.pipeline_mode<synchronous>, transform_indices = @transform_3, window_bounds = array<i64: 8, 1>}, {pipeline_mode = #tpu.pipeline_mode<synchronous>, transform_indices = @transform_4, window_bounds = array<i64: 8, 1>}, {transform_indices = @transform_5, window_bounds = array<i64: 1, 8, 224>}]} {
    %c0 = arith.constant 0 : index
    %c0_0 = arith.constant 0 : index
    %0 = vector.load %arg2[%c0, %c0_0] : memref<8x36xf32, #tpu.memory_space<vmem>>, vector<8x36xf32>
    %c0_1 = arith.constant 0 : index
    %c0_2 = arith.constant 0 : index
    %c0_3 = arith.constant 0 : index
    %1 = vector.load %arg1[%c0_1, %c0_2, %c0_3] : memref<1x4x258xf32, #tpu.memory_space<vmem>>, vector<1x1x258xf32>
    %2 = vector.shape_cast %1 : vector<1x1x258xf32> to vector<1x258xf32>
    %3 = vector.shape_cast %2 : vector<1x258xf32> to vector<1x258xf32>
    %4 = vector.broadcast %3 : vector<1x258xf32> to vector<8x258xf32>
    %5 = vector.extract_strided_slice %4 {offsets = [0, 0], sizes = [8, 224], strides = [1, 1]} : vector<8x258xf32> to vector<8x224xf32>
    %6 = vector.extract_strided_slice %0 {offsets = [0, 0], sizes = [8, 1], strides = [1, 1]} : vector<8x36xf32> to vector<8x1xf32>
    %7 = vector.broadcast %6 : vector<8x1xf32> to vector<8x224xf32>
    %8 = arith.mulf %5, %7 : vector<8x224xf32>
    %9 = vector.extract_strided_slice %4 {offsets = [0, 1], sizes = [8, 224], strides = [1, 1]} : vector<8x258xf32> to vector<8x224xf32>
    %10 = vector.extract_strided_slice %0 {offsets = [0, 1], sizes = [8, 1], strides = [1, 1]} : vector<8x36xf32> to vector<8x1xf32>
    %11 = vector.broadcast %10 : vector<8x1xf32> to vector<8x224xf32>
    %12 = arith.mulf %9, %11 : vector<8x224xf32>
    %13 = arith.addf %8, %12 : vector<8x224xf32>
    %14 = vector.extract_strided_slice %4 {offsets = [0, 2], sizes = [8, 224], strides = [1, 1]} : vector<8x258xf32> to vector<8x224xf32>
    %15 = vector.extract_strided_slice %0 {offsets = [0, 2], sizes = [8, 1], strides = [1, 1]} : vector<8x36xf32> to vector<8x1xf32>
    %16 = vector.broadcast %15 : vector<8x1xf32> to vector<8x224xf32>
    %17 = arith.mulf %14, %16 : vector<8x224xf32>
    %18 = arith.addf %13, %17 : vector<8x224xf32>
    %19 = vector.extract_strided_slice %4 {offsets = [0, 16], sizes = [8, 224], strides = [1, 1]} : vector<8x258xf32> to vector<8x224xf32>
    %20 = vector.extract_strided_slice %0 {offsets = [0, 3], sizes = [8, 1], strides = [1, 1]} : vector<8x36xf32> to vector<8x1xf32>
    %21 = vector.broadcast %20 : vector<8x1xf32> to vector<8x224xf32>
    %22 = arith.mulf %19, %21 : vector<8x224xf32>
    %23 = arith.addf %18, %22 : vector<8x224xf32>
    %24 = vector.extract_strided_slice %4 {offsets = [0, 17], sizes = [8, 224], strides = [1, 1]} : vector<8x258xf32> to vector<8x224xf32>
    %25 = vector.extract_strided_slice %0 {offsets = [0, 4], sizes = [8, 1], strides = [1, 1]} : vector<8x36xf32> to vector<8x1xf32>
    %26 = vector.broadcast %25 : vector<8x1xf32> to vector<8x224xf32>
    %27 = arith.mulf %24, %26 : vector<8x224xf32>
    %28 = arith.addf %23, %27 : vector<8x224xf32>
    %29 = vector.extract_strided_slice %4 {offsets = [0, 18], sizes = [8, 224], strides = [1, 1]} : vector<8x258xf32> to vector<8x224xf32>
    %30 = vector.extract_strided_slice %0 {offsets = [0, 5], sizes = [8, 1], strides = [1, 1]} : vector<8x36xf32> to vector<8x1xf32>
    %31 = vector.broadcast %30 : vector<8x1xf32> to vector<8x224xf32>
    %32 = arith.mulf %29, %31 : vector<8x224xf32>
    %33 = arith.addf %28, %32 : vector<8x224xf32>
    %34 = vector.extract_strided_slice %4 {offsets = [0, 32], sizes = [8, 224], strides = [1, 1]} : vector<8x258xf32> to vector<8x224xf32>
    %35 = vector.extract_strided_slice %0 {offsets = [0, 6], sizes = [8, 1], strides = [1, 1]} : vector<8x36xf32> to vector<8x1xf32>
    %36 = vector.broadcast %35 : vector<8x1xf32> to vector<8x224xf32>
    %37 = arith.mulf %34, %36 : vector<8x224xf32>
    %38 = arith.addf %33, %37 : vector<8x224xf32>
    %39 = vector.extract_strided_slice %4 {offsets = [0, 33], sizes = [8, 224], strides = [1, 1]} : vector<8x258xf32> to vector<8x224xf32>
    %40 = vector.extract_strided_slice %0 {offsets = [0, 7], sizes = [8, 1], strides = [1, 1]} : vector<8x36xf32> to vector<8x1xf32>
    %41 = vector.broadcast %40 : vector<8x1xf32> to vector<8x224xf32>
    %42 = arith.mulf %39, %41 : vector<8x224xf32>
    %43 = arith.addf %38, %42 : vector<8x224xf32>
    %44 = vector.extract_strided_slice %4 {offsets = [0, 34], sizes = [8, 224], strides = [1, 1]} : vector<8x258xf32> to vector<8x224xf32>
    %45 = vector.extract_strided_slice %0 {offsets = [0, 8], sizes = [8, 1], strides = [1, 1]} : vector<8x36xf32> to vector<8x1xf32>
    %46 = vector.broadcast %45 : vector<8x1xf32> to vector<8x224xf32>
    %47 = arith.mulf %44, %46 : vector<8x224xf32>
    %48 = arith.addf %43, %47 : vector<8x224xf32>
    %c0_4 = arith.constant 0 : index
    %c1 = arith.constant 1 : index
    %c0_5 = arith.constant 0 : index
    %49 = vector.load %arg1[%c0_4, %c1, %c0_5] : memref<1x4x258xf32, #tpu.memory_space<vmem>>, vector<1x1x258xf32>
    %50 = vector.shape_cast %49 : vector<1x1x258xf32> to vector<1x258xf32>
    %51 = vector.shape_cast %50 : vector<1x258xf32> to vector<1x258xf32>
    %52 = vector.broadcast %51 : vector<1x258xf32> to vector<8x258xf32>
    %53 = vector.extract_strided_slice %52 {offsets = [0, 0], sizes = [8, 224], strides = [1, 1]} : vector<8x258xf32> to vector<8x224xf32>
    %54 = vector.extract_strided_slice %0 {offsets = [0, 9], sizes = [8, 1], strides = [1, 1]} : vector<8x36xf32> to vector<8x1xf32>
    %55 = vector.broadcast %54 : vector<8x1xf32> to vector<8x224xf32>
    %56 = arith.mulf %53, %55 : vector<8x224xf32>
    %57 = vector.extract_strided_slice %52 {offsets = [0, 1], sizes = [8, 224], strides = [1, 1]} : vector<8x258xf32> to vector<8x224xf32>
    %58 = vector.extract_strided_slice %0 {offsets = [0, 10], sizes = [8, 1], strides = [1, 1]} : vector<8x36xf32> to vector<8x1xf32>
    %59 = vector.broadcast %58 : vector<8x1xf32> to vector<8x224xf32>
    %60 = arith.mulf %57, %59 : vector<8x224xf32>
    %61 = arith.addf %56, %60 : vector<8x224xf32>
    %62 = vector.extract_strided_slice %52 {offsets = [0, 2], sizes = [8, 224], strides = [1, 1]} : vector<8x258xf32> to vector<8x224xf32>
    %63 = vector.extract_strided_slice %0 {offsets = [0, 11], sizes = [8, 1], strides = [1, 1]} : vector<8x36xf32> to vector<8x1xf32>
    %64 = vector.broadcast %63 : vector<8x1xf32> to vector<8x224xf32>
    %65 = arith.mulf %62, %64 : vector<8x224xf32>
    %66 = arith.addf %61, %65 : vector<8x224xf32>
    %67 = vector.extract_strided_slice %52 {offsets = [0, 16], sizes = [8, 224], strides = [1, 1]} : vector<8x258xf32> to vector<8x224xf32>
    %68 = vector.extract_strided_slice %0 {offsets = [0, 12], sizes = [8, 1], strides = [1, 1]} : vector<8x36xf32> to vector<8x1xf32>
    %69 = vector.broadcast %68 : vector<8x1xf32> to vector<8x224xf32>
    %70 = arith.mulf %67, %69 : vector<8x224xf32>
    %71 = arith.addf %66, %70 : vector<8x224xf32>
    %72 = vector.extract_strided_slice %52 {offsets = [0, 17], sizes = [8, 224], strides = [1, 1]} : vector<8x258xf32> to vector<8x224xf32>
    %73 = vector.extract_strided_slice %0 {offsets = [0, 13], sizes = [8, 1], strides = [1, 1]} : vector<8x36xf32> to vector<8x1xf32>
    %74 = vector.broadcast %73 : vector<8x1xf32> to vector<8x224xf32>
    %75 = arith.mulf %72, %74 : vector<8x224xf32>
    %76 = arith.addf %71, %75 : vector<8x224xf32>
    %77 = vector.extract_strided_slice %52 {offsets = [0, 18], sizes = [8, 224], strides = [1, 1]} : vector<8x258xf32> to vector<8x224xf32>
    %78 = vector.extract_strided_slice %0 {offsets = [0, 14], sizes = [8, 1], strides = [1, 1]} : vector<8x36xf32> to vector<8x1xf32>
    %79 = vector.broadcast %78 : vector<8x1xf32> to vector<8x224xf32>
    %80 = arith.mulf %77, %79 : vector<8x224xf32>
    %81 = arith.addf %76, %80 : vector<8x224xf32>
    %82 = vector.extract_strided_slice %52 {offsets = [0, 32], sizes = [8, 224], strides = [1, 1]} : vector<8x258xf32> to vector<8x224xf32>
    %83 = vector.extract_strided_slice %0 {offsets = [0, 15], sizes = [8, 1], strides = [1, 1]} : vector<8x36xf32> to vector<8x1xf32>
    %84 = vector.broadcast %83 : vector<8x1xf32> to vector<8x224xf32>
    %85 = arith.mulf %82, %84 : vector<8x224xf32>
    %86 = arith.addf %81, %85 : vector<8x224xf32>
    %87 = vector.extract_strided_slice %52 {offsets = [0, 33], sizes = [8, 224], strides = [1, 1]} : vector<8x258xf32> to vector<8x224xf32>
    %88 = vector.extract_strided_slice %0 {offsets = [0, 16], sizes = [8, 1], strides = [1, 1]} : vector<8x36xf32> to vector<8x1xf32>
    %89 = vector.broadcast %88 : vector<8x1xf32> to vector<8x224xf32>
    %90 = arith.mulf %87, %89 : vector<8x224xf32>
    %91 = arith.addf %86, %90 : vector<8x224xf32>
    %92 = vector.extract_strided_slice %52 {offsets = [0, 34], sizes = [8, 224], strides = [1, 1]} : vector<8x258xf32> to vector<8x224xf32>
    %93 = vector.extract_strided_slice %0 {offsets = [0, 17], sizes = [8, 1], strides = [1, 1]} : vector<8x36xf32> to vector<8x1xf32>
    %94 = vector.broadcast %93 : vector<8x1xf32> to vector<8x224xf32>
    %95 = arith.mulf %92, %94 : vector<8x224xf32>
    %96 = arith.addf %91, %95 : vector<8x224xf32>
    %c0_6 = arith.constant 0 : index
    %c2 = arith.constant 2 : index
    %c0_7 = arith.constant 0 : index
    %97 = vector.load %arg1[%c0_6, %c2, %c0_7] : memref<1x4x258xf32, #tpu.memory_space<vmem>>, vector<1x1x258xf32>
    %98 = vector.shape_cast %97 : vector<1x1x258xf32> to vector<1x258xf32>
    %99 = vector.shape_cast %98 : vector<1x258xf32> to vector<1x258xf32>
    %100 = vector.broadcast %99 : vector<1x258xf32> to vector<8x258xf32>
    %101 = vector.extract_strided_slice %100 {offsets = [0, 0], sizes = [8, 224], strides = [1, 1]} : vector<8x258xf32> to vector<8x224xf32>
    %102 = vector.extract_strided_slice %0 {offsets = [0, 18], sizes = [8, 1], strides = [1, 1]} : vector<8x36xf32> to vector<8x1xf32>
    %103 = vector.broadcast %102 : vector<8x1xf32> to vector<8x224xf32>
    %104 = arith.mulf %101, %103 : vector<8x224xf32>
    %105 = vector.extract_strided_slice %100 {offsets = [0, 1], sizes = [8, 224], strides = [1, 1]} : vector<8x258xf32> to vector<8x224xf32>
    %106 = vector.extract_strided_slice %0 {offsets = [0, 19], sizes = [8, 1], strides = [1, 1]} : vector<8x36xf32> to vector<8x1xf32>
    %107 = vector.broadcast %106 : vector<8x1xf32> to vector<8x224xf32>
    %108 = arith.mulf %105, %107 : vector<8x224xf32>
    %109 = arith.addf %104, %108 : vector<8x224xf32>
    %110 = vector.extract_strided_slice %100 {offsets = [0, 2], sizes = [8, 224], strides = [1, 1]} : vector<8x258xf32> to vector<8x224xf32>
    %111 = vector.extract_strided_slice %0 {offsets = [0, 20], sizes = [8, 1], strides = [1, 1]} : vector<8x36xf32> to vector<8x1xf32>
    %112 = vector.broadcast %111 : vector<8x1xf32> to vector<8x224xf32>
    %113 = arith.mulf %110, %112 : vector<8x224xf32>
    %114 = arith.addf %109, %113 : vector<8x224xf32>
    %115 = vector.extract_strided_slice %100 {offsets = [0, 16], sizes = [8, 224], strides = [1, 1]} : vector<8x258xf32> to vector<8x224xf32>
    %116 = vector.extract_strided_slice %0 {offsets = [0, 21], sizes = [8, 1], strides = [1, 1]} : vector<8x36xf32> to vector<8x1xf32>
    %117 = vector.broadcast %116 : vector<8x1xf32> to vector<8x224xf32>
    %118 = arith.mulf %115, %117 : vector<8x224xf32>
    %119 = arith.addf %114, %118 : vector<8x224xf32>
    %120 = vector.extract_strided_slice %100 {offsets = [0, 17], sizes = [8, 224], strides = [1, 1]} : vector<8x258xf32> to vector<8x224xf32>
    %121 = vector.extract_strided_slice %0 {offsets = [0, 22], sizes = [8, 1], strides = [1, 1]} : vector<8x36xf32> to vector<8x1xf32>
    %122 = vector.broadcast %121 : vector<8x1xf32> to vector<8x224xf32>
    %123 = arith.mulf %120, %122 : vector<8x224xf32>
    %124 = arith.addf %119, %123 : vector<8x224xf32>
    %125 = vector.extract_strided_slice %100 {offsets = [0, 18], sizes = [8, 224], strides = [1, 1]} : vector<8x258xf32> to vector<8x224xf32>
    %126 = vector.extract_strided_slice %0 {offsets = [0, 23], sizes = [8, 1], strides = [1, 1]} : vector<8x36xf32> to vector<8x1xf32>
    %127 = vector.broadcast %126 : vector<8x1xf32> to vector<8x224xf32>
    %128 = arith.mulf %125, %127 : vector<8x224xf32>
    %129 = arith.addf %124, %128 : vector<8x224xf32>
    %130 = vector.extract_strided_slice %100 {offsets = [0, 32], sizes = [8, 224], strides = [1, 1]} : vector<8x258xf32> to vector<8x224xf32>
    %131 = vector.extract_strided_slice %0 {offsets = [0, 24], sizes = [8, 1], strides = [1, 1]} : vector<8x36xf32> to vector<8x1xf32>
    %132 = vector.broadcast %131 : vector<8x1xf32> to vector<8x224xf32>
    %133 = arith.mulf %130, %132 : vector<8x224xf32>
    %134 = arith.addf %129, %133 : vector<8x224xf32>
    %135 = vector.extract_strided_slice %100 {offsets = [0, 33], sizes = [8, 224], strides = [1, 1]} : vector<8x258xf32> to vector<8x224xf32>
    %136 = vector.extract_strided_slice %0 {offsets = [0, 25], sizes = [8, 1], strides = [1, 1]} : vector<8x36xf32> to vector<8x1xf32>
    %137 = vector.broadcast %136 : vector<8x1xf32> to vector<8x224xf32>
    %138 = arith.mulf %135, %137 : vector<8x224xf32>
    %139 = arith.addf %134, %138 : vector<8x224xf32>
    %140 = vector.extract_strided_slice %100 {offsets = [0, 34], sizes = [8, 224], strides = [1, 1]} : vector<8x258xf32> to vector<8x224xf32>
    %141 = vector.extract_strided_slice %0 {offsets = [0, 26], sizes = [8, 1], strides = [1, 1]} : vector<8x36xf32> to vector<8x1xf32>
    %142 = vector.broadcast %141 : vector<8x1xf32> to vector<8x224xf32>
    %143 = arith.mulf %140, %142 : vector<8x224xf32>
    %144 = arith.addf %139, %143 : vector<8x224xf32>
    %c0_8 = arith.constant 0 : index
    %c3 = arith.constant 3 : index
    %c0_9 = arith.constant 0 : index
    %145 = vector.load %arg1[%c0_8, %c3, %c0_9] : memref<1x4x258xf32, #tpu.memory_space<vmem>>, vector<1x1x258xf32>
    %146 = vector.shape_cast %145 : vector<1x1x258xf32> to vector<1x258xf32>
    %147 = vector.shape_cast %146 : vector<1x258xf32> to vector<1x258xf32>
    %148 = vector.broadcast %147 : vector<1x258xf32> to vector<8x258xf32>
    %149 = vector.extract_strided_slice %148 {offsets = [0, 0], sizes = [8, 224], strides = [1, 1]} : vector<8x258xf32> to vector<8x224xf32>
    %150 = vector.extract_strided_slice %0 {offsets = [0, 27], sizes = [8, 1], strides = [1, 1]} : vector<8x36xf32> to vector<8x1xf32>
    %151 = vector.broadcast %150 : vector<8x1xf32> to vector<8x224xf32>
    %152 = arith.mulf %149, %151 : vector<8x224xf32>
    %153 = vector.extract_strided_slice %148 {offsets = [0, 1], sizes = [8, 224], strides = [1, 1]} : vector<8x258xf32> to vector<8x224xf32>
    %154 = vector.extract_strided_slice %0 {offsets = [0, 28], sizes = [8, 1], strides = [1, 1]} : vector<8x36xf32> to vector<8x1xf32>
    %155 = vector.broadcast %154 : vector<8x1xf32> to vector<8x224xf32>
    %156 = arith.mulf %153, %155 : vector<8x224xf32>
    %157 = arith.addf %152, %156 : vector<8x224xf32>
    %158 = vector.extract_strided_slice %148 {offsets = [0, 2], sizes = [8, 224], strides = [1, 1]} : vector<8x258xf32> to vector<8x224xf32>
    %159 = vector.extract_strided_slice %0 {offsets = [0, 29], sizes = [8, 1], strides = [1, 1]} : vector<8x36xf32> to vector<8x1xf32>
    %160 = vector.broadcast %159 : vector<8x1xf32> to vector<8x224xf32>
    %161 = arith.mulf %158, %160 : vector<8x224xf32>
    %162 = arith.addf %157, %161 : vector<8x224xf32>
    %163 = vector.extract_strided_slice %148 {offsets = [0, 16], sizes = [8, 224], strides = [1, 1]} : vector<8x258xf32> to vector<8x224xf32>
    %164 = vector.extract_strided_slice %0 {offsets = [0, 30], sizes = [8, 1], strides = [1, 1]} : vector<8x36xf32> to vector<8x1xf32>
    %165 = vector.broadcast %164 : vector<8x1xf32> to vector<8x224xf32>
    %166 = arith.mulf %163, %165 : vector<8x224xf32>
    %167 = arith.addf %162, %166 : vector<8x224xf32>
    %168 = vector.extract_strided_slice %148 {offsets = [0, 17], sizes = [8, 224], strides = [1, 1]} : vector<8x258xf32> to vector<8x224xf32>
    %169 = vector.extract_strided_slice %0 {offsets = [0, 31], sizes = [8, 1], strides = [1, 1]} : vector<8x36xf32> to vector<8x1xf32>
    %170 = vector.broadcast %169 : vector<8x1xf32> to vector<8x224xf32>
    %171 = arith.mulf %168, %170 : vector<8x224xf32>
    %172 = arith.addf %167, %171 : vector<8x224xf32>
    %173 = vector.extract_strided_slice %148 {offsets = [0, 18], sizes = [8, 224], strides = [1, 1]} : vector<8x258xf32> to vector<8x224xf32>
    %174 = vector.extract_strided_slice %0 {offsets = [0, 32], sizes = [8, 1], strides = [1, 1]} : vector<8x36xf32> to vector<8x1xf32>
    %175 = vector.broadcast %174 : vector<8x1xf32> to vector<8x224xf32>
    %176 = arith.mulf %173, %175 : vector<8x224xf32>
    %177 = arith.addf %172, %176 : vector<8x224xf32>
    %178 = vector.extract_strided_slice %148 {offsets = [0, 32], sizes = [8, 224], strides = [1, 1]} : vector<8x258xf32> to vector<8x224xf32>
    %179 = vector.extract_strided_slice %0 {offsets = [0, 33], sizes = [8, 1], strides = [1, 1]} : vector<8x36xf32> to vector<8x1xf32>
    %180 = vector.broadcast %179 : vector<8x1xf32> to vector<8x224xf32>
    %181 = arith.mulf %178, %180 : vector<8x224xf32>
    %182 = arith.addf %177, %181 : vector<8x224xf32>
    %183 = vector.extract_strided_slice %148 {offsets = [0, 33], sizes = [8, 224], strides = [1, 1]} : vector<8x258xf32> to vector<8x224xf32>
    %184 = vector.extract_strided_slice %0 {offsets = [0, 34], sizes = [8, 1], strides = [1, 1]} : vector<8x36xf32> to vector<8x1xf32>
    %185 = vector.broadcast %184 : vector<8x1xf32> to vector<8x224xf32>
    %186 = arith.mulf %183, %185 : vector<8x224xf32>
    %187 = arith.addf %182, %186 : vector<8x224xf32>
    %188 = vector.extract_strided_slice %148 {offsets = [0, 34], sizes = [8, 224], strides = [1, 1]} : vector<8x258xf32> to vector<8x224xf32>
    %189 = vector.extract_strided_slice %0 {offsets = [0, 35], sizes = [8, 1], strides = [1, 1]} : vector<8x36xf32> to vector<8x1xf32>
    %190 = vector.broadcast %189 : vector<8x1xf32> to vector<8x224xf32>
    %191 = arith.mulf %188, %190 : vector<8x224xf32>
    %192 = arith.addf %187, %191 : vector<8x224xf32>
    %193 = arith.addf %48, %96 : vector<8x224xf32>
    %194 = arith.addf %193, %144 : vector<8x224xf32>
    %195 = arith.addf %194, %192 : vector<8x224xf32>
    %c0_10 = arith.constant 0 : index
    %c0_11 = arith.constant 0 : index
    %196 = vector.load %arg3[%c0_10, %c0_11] : memref<8x1xf32, #tpu.memory_space<vmem>>, vector<8x1xf32>
    %197 = vector.broadcast %196 : vector<8x1xf32> to vector<8x224xf32>
    %198 = arith.addf %195, %197 : vector<8x224xf32>
    %cst = arith.constant 0.000000e+00 : f32
    %199 = vector.broadcast %cst : f32 to vector<8x224xf32>
    %200 = arith.maximumf %198, %199 : vector<8x224xf32>
    %c0_12 = arith.constant 0 : index
    %c0_13 = arith.constant 0 : index
    %201 = vector.load %arg4[%c0_12, %c0_13] : memref<8x1xf32, #tpu.memory_space<vmem>>, vector<8x1xf32>
    %202 = vector.broadcast %201 : vector<8x1xf32> to vector<8x224xf32>
    %203 = arith.mulf %200, %202 : vector<8x224xf32>
    %c0_14 = arith.constant 0 : index
    %c0_15 = arith.constant 0 : index
    %204 = vector.load %arg5[%c0_14, %c0_15] : memref<8x1xf32, #tpu.memory_space<vmem>>, vector<8x1xf32>
    %205 = vector.broadcast %204 : vector<8x1xf32> to vector<8x224xf32>
    %206 = arith.addf %203, %205 : vector<8x224xf32>
    %c0_16 = arith.constant 0 : index
    %c0_17 = arith.constant 0 : index
    %c0_18 = arith.constant 0 : index
    %207 = vector.load %arg6[%c0_16, %c0_17, %c0_18] : memref<1x8x224xf32, #tpu.memory_space<vmem>>, vector<1x8x224xf32>
    %208 = vector.shape_cast %207 : vector<1x8x224xf32> to vector<8x224xf32>
    %209 = vector.shape_cast %206 : vector<8x224xf32> to vector<1x8x224xf32>
    tpu.vector_store %arg6[%c0_16, %c0_17, %c0_18], %209 {strides = array<i32>} : memref<1x8x224xf32, #tpu.memory_space<vmem>>, vector<1x8x224xf32>,
    return
  }
  func.func @transform_0(%arg0: i32) -> (i32, i32, i32) {
    %c0_i32 = arith.constant 0 : i32
    %c0_i32_0 = arith.constant 0 : i32
    %c0_i32_1 = arith.constant 0 : i32
    return %arg0, %c0_i32, %c0_i32_0 : i32, i32, i32
  }
  func.func @transform_1(%arg0: i32) -> (i32, i32) {
    %c0_i32 = arith.constant 0 : i32
    %c0_i32_0 = arith.constant 0 : i32
    %c0_i32_1 = arith.constant 0 : i32
    return %c0_i32, %c0_i32_0 : i32, i32
  }
  func.func @transform_2(%arg0: i32) -> (i32, i32) {
    %c0_i32 = arith.constant 0 : i32
    %c0_i32_0 = arith.constant 0 : i32
    %c0_i32_1 = arith.constant 0 : i32
    return %c0_i32, %c0_i32_0 : i32, i32
  }
  func.func @transform_3(%arg0: i32) -> (i32, i32) {
    %c0_i32 = arith.constant 0 : i32
    %c0_i32_0 = arith.constant 0 : i32
    %c0_i32_1 = arith.constant 0 : i32
    return %c0_i32, %c0_i32_0 : i32, i32
  }
  func.func @transform_4(%arg0: i32) -> (i32, i32) {
    %c0_i32 = arith.constant 0 : i32
    %c0_i32_0 = arith.constant 0 : i32
    %c0_i32_1 = arith.constant 0 : i32
    return %c0_i32, %c0_i32_0 : i32, i32
  }
  func.func @transform_5(%arg0: i32) -> (i32, i32, i32) {
    %c0_i32 = arith.constant 0 : i32
    %c0_i32_0 = arith.constant 0 : i32
    %c0_i32_1 = arith.constant 0 : i32
    return %arg0, %c0_i32, %c0_i32_0 : i32, i32, i32
  }
}

module attributes {stable_mosaic.version = 11 : i64} {
  func.func @_stats_kernel(%arg0: i32, %arg1: memref<1x4x258xf32, #tpu.memory_space<vmem>>, %arg2: memref<8x36xf32, #tpu.memory_space<vmem>>, %arg3: memref<8x1xf32, #tpu.memory_space<vmem>>, %arg4: memref<1x224xf32, #tpu.memory_space<vmem>>, %arg5: memref<1x8x2xf32, #tpu.memory_space<vmem>>) attributes {dimension_semantics = [#tpu.dimension_semantics<parallel>], iteration_bounds = array<i64: 2>, scalar_prefetch = 0 : i64, scratch_operands = 0 : i64, tpu.core_type = #tpu.core_type<tc>, window_params = [{transform_indices = @transform_0, window_bounds = array<i64: 1, 4, 258>}, {pipeline_mode = #tpu.pipeline_mode<synchronous>, transform_indices = @transform_1, window_bounds = array<i64: 8, 36>}, {pipeline_mode = #tpu.pipeline_mode<synchronous>, transform_indices = @transform_2, window_bounds = array<i64: 8, 1>}, {pipeline_mode = #tpu.pipeline_mode<synchronous>, transform_indices = @transform_3, window_bounds = array<i64: 1, 224>}, {transform_indices = @transform_4, window_bounds = array<i64: 1, 8, 2>}]} {
    %c0 = arith.constant 0 : index
    %c0_0 = arith.constant 0 : index
    %0 = vector.load %arg2[%c0, %c0_0] : memref<8x36xf32, #tpu.memory_space<vmem>>, vector<8x36xf32>
    %c0_1 = arith.constant 0 : index
    %c0_2 = arith.constant 0 : index
    %c0_3 = arith.constant 0 : index
    %1 = vector.load %arg1[%c0_1, %c0_2, %c0_3] : memref<1x4x258xf32, #tpu.memory_space<vmem>>, vector<1x1x258xf32>
    %2 = vector.shape_cast %1 : vector<1x1x258xf32> to vector<1x258xf32>
    %3 = vector.shape_cast %2 : vector<1x258xf32> to vector<1x258xf32>
    %4 = vector.broadcast %3 : vector<1x258xf32> to vector<8x258xf32>
    %5 = vector.extract_strided_slice %4 {offsets = [0, 0], sizes = [8, 224], strides = [1, 1]} : vector<8x258xf32> to vector<8x224xf32>
    %6 = vector.extract_strided_slice %0 {offsets = [0, 0], sizes = [8, 1], strides = [1, 1]} : vector<8x36xf32> to vector<8x1xf32>
    %7 = vector.broadcast %6 : vector<8x1xf32> to vector<8x224xf32>
    %8 = arith.mulf %5, %7 : vector<8x224xf32>
    %9 = vector.extract_strided_slice %4 {offsets = [0, 1], sizes = [8, 224], strides = [1, 1]} : vector<8x258xf32> to vector<8x224xf32>
    %10 = vector.extract_strided_slice %0 {offsets = [0, 1], sizes = [8, 1], strides = [1, 1]} : vector<8x36xf32> to vector<8x1xf32>
    %11 = vector.broadcast %10 : vector<8x1xf32> to vector<8x224xf32>
    %12 = arith.mulf %9, %11 : vector<8x224xf32>
    %13 = arith.addf %8, %12 : vector<8x224xf32>
    %14 = vector.extract_strided_slice %4 {offsets = [0, 2], sizes = [8, 224], strides = [1, 1]} : vector<8x258xf32> to vector<8x224xf32>
    %15 = vector.extract_strided_slice %0 {offsets = [0, 2], sizes = [8, 1], strides = [1, 1]} : vector<8x36xf32> to vector<8x1xf32>
    %16 = vector.broadcast %15 : vector<8x1xf32> to vector<8x224xf32>
    %17 = arith.mulf %14, %16 : vector<8x224xf32>
    %18 = arith.addf %13, %17 : vector<8x224xf32>
    %19 = vector.extract_strided_slice %4 {offsets = [0, 16], sizes = [8, 224], strides = [1, 1]} : vector<8x258xf32> to vector<8x224xf32>
    %20 = vector.extract_strided_slice %0 {offsets = [0, 3], sizes = [8, 1], strides = [1, 1]} : vector<8x36xf32> to vector<8x1xf32>
    %21 = vector.broadcast %20 : vector<8x1xf32> to vector<8x224xf32>
    %22 = arith.mulf %19, %21 : vector<8x224xf32>
    %23 = arith.addf %18, %22 : vector<8x224xf32>
    %24 = vector.extract_strided_slice %4 {offsets = [0, 17], sizes = [8, 224], strides = [1, 1]} : vector<8x258xf32> to vector<8x224xf32>
    %25 = vector.extract_strided_slice %0 {offsets = [0, 4], sizes = [8, 1], strides = [1, 1]} : vector<8x36xf32> to vector<8x1xf32>
    %26 = vector.broadcast %25 : vector<8x1xf32> to vector<8x224xf32>
    %27 = arith.mulf %24, %26 : vector<8x224xf32>
    %28 = arith.addf %23, %27 : vector<8x224xf32>
    %29 = vector.extract_strided_slice %4 {offsets = [0, 18], sizes = [8, 224], strides = [1, 1]} : vector<8x258xf32> to vector<8x224xf32>
    %30 = vector.extract_strided_slice %0 {offsets = [0, 5], sizes = [8, 1], strides = [1, 1]} : vector<8x36xf32> to vector<8x1xf32>
    %31 = vector.broadcast %30 : vector<8x1xf32> to vector<8x224xf32>
    %32 = arith.mulf %29, %31 : vector<8x224xf32>
    %33 = arith.addf %28, %32 : vector<8x224xf32>
    %34 = vector.extract_strided_slice %4 {offsets = [0, 32], sizes = [8, 224], strides = [1, 1]} : vector<8x258xf32> to vector<8x224xf32>
    %35 = vector.extract_strided_slice %0 {offsets = [0, 6], sizes = [8, 1], strides = [1, 1]} : vector<8x36xf32> to vector<8x1xf32>
    %36 = vector.broadcast %35 : vector<8x1xf32> to vector<8x224xf32>
    %37 = arith.mulf %34, %36 : vector<8x224xf32>
    %38 = arith.addf %33, %37 : vector<8x224xf32>
    %39 = vector.extract_strided_slice %4 {offsets = [0, 33], sizes = [8, 224], strides = [1, 1]} : vector<8x258xf32> to vector<8x224xf32>
    %40 = vector.extract_strided_slice %0 {offsets = [0, 7], sizes = [8, 1], strides = [1, 1]} : vector<8x36xf32> to vector<8x1xf32>
    %41 = vector.broadcast %40 : vector<8x1xf32> to vector<8x224xf32>
    %42 = arith.mulf %39, %41 : vector<8x224xf32>
    %43 = arith.addf %38, %42 : vector<8x224xf32>
    %44 = vector.extract_strided_slice %4 {offsets = [0, 34], sizes = [8, 224], strides = [1, 1]} : vector<8x258xf32> to vector<8x224xf32>
    %45 = vector.extract_strided_slice %0 {offsets = [0, 8], sizes = [8, 1], strides = [1, 1]} : vector<8x36xf32> to vector<8x1xf32>
    %46 = vector.broadcast %45 : vector<8x1xf32> to vector<8x224xf32>
    %47 = arith.mulf %44, %46 : vector<8x224xf32>
    %48 = arith.addf %43, %47 : vector<8x224xf32>
    %c0_4 = arith.constant 0 : index
    %c1 = arith.constant 1 : index
    %c0_5 = arith.constant 0 : index
    %49 = vector.load %arg1[%c0_4, %c1, %c0_5] : memref<1x4x258xf32, #tpu.memory_space<vmem>>, vector<1x1x258xf32>
    %50 = vector.shape_cast %49 : vector<1x1x258xf32> to vector<1x258xf32>
    %51 = vector.shape_cast %50 : vector<1x258xf32> to vector<1x258xf32>
    %52 = vector.broadcast %51 : vector<1x258xf32> to vector<8x258xf32>
    %53 = vector.extract_strided_slice %52 {offsets = [0, 0], sizes = [8, 224], strides = [1, 1]} : vector<8x258xf32> to vector<8x224xf32>
    %54 = vector.extract_strided_slice %0 {offsets = [0, 9], sizes = [8, 1], strides = [1, 1]} : vector<8x36xf32> to vector<8x1xf32>
    %55 = vector.broadcast %54 : vector<8x1xf32> to vector<8x224xf32>
    %56 = arith.mulf %53, %55 : vector<8x224xf32>
    %57 = vector.extract_strided_slice %52 {offsets = [0, 1], sizes = [8, 224], strides = [1, 1]} : vector<8x258xf32> to vector<8x224xf32>
    %58 = vector.extract_strided_slice %0 {offsets = [0, 10], sizes = [8, 1], strides = [1, 1]} : vector<8x36xf32> to vector<8x1xf32>
    %59 = vector.broadcast %58 : vector<8x1xf32> to vector<8x224xf32>
    %60 = arith.mulf %57, %59 : vector<8x224xf32>
    %61 = arith.addf %56, %60 : vector<8x224xf32>
    %62 = vector.extract_strided_slice %52 {offsets = [0, 2], sizes = [8, 224], strides = [1, 1]} : vector<8x258xf32> to vector<8x224xf32>
    %63 = vector.extract_strided_slice %0 {offsets = [0, 11], sizes = [8, 1], strides = [1, 1]} : vector<8x36xf32> to vector<8x1xf32>
    %64 = vector.broadcast %63 : vector<8x1xf32> to vector<8x224xf32>
    %65 = arith.mulf %62, %64 : vector<8x224xf32>
    %66 = arith.addf %61, %65 : vector<8x224xf32>
    %67 = vector.extract_strided_slice %52 {offsets = [0, 16], sizes = [8, 224], strides = [1, 1]} : vector<8x258xf32> to vector<8x224xf32>
    %68 = vector.extract_strided_slice %0 {offsets = [0, 12], sizes = [8, 1], strides = [1, 1]} : vector<8x36xf32> to vector<8x1xf32>
    %69 = vector.broadcast %68 : vector<8x1xf32> to vector<8x224xf32>
    %70 = arith.mulf %67, %69 : vector<8x224xf32>
    %71 = arith.addf %66, %70 : vector<8x224xf32>
    %72 = vector.extract_strided_slice %52 {offsets = [0, 17], sizes = [8, 224], strides = [1, 1]} : vector<8x258xf32> to vector<8x224xf32>
    %73 = vector.extract_strided_slice %0 {offsets = [0, 13], sizes = [8, 1], strides = [1, 1]} : vector<8x36xf32> to vector<8x1xf32>
    %74 = vector.broadcast %73 : vector<8x1xf32> to vector<8x224xf32>
    %75 = arith.mulf %72, %74 : vector<8x224xf32>
    %76 = arith.addf %71, %75 : vector<8x224xf32>
    %77 = vector.extract_strided_slice %52 {offsets = [0, 18], sizes = [8, 224], strides = [1, 1]} : vector<8x258xf32> to vector<8x224xf32>
    %78 = vector.extract_strided_slice %0 {offsets = [0, 14], sizes = [8, 1], strides = [1, 1]} : vector<8x36xf32> to vector<8x1xf32>
    %79 = vector.broadcast %78 : vector<8x1xf32> to vector<8x224xf32>
    %80 = arith.mulf %77, %79 : vector<8x224xf32>
    %81 = arith.addf %76, %80 : vector<8x224xf32>
    %82 = vector.extract_strided_slice %52 {offsets = [0, 32], sizes = [8, 224], strides = [1, 1]} : vector<8x258xf32> to vector<8x224xf32>
    %83 = vector.extract_strided_slice %0 {offsets = [0, 15], sizes = [8, 1], strides = [1, 1]} : vector<8x36xf32> to vector<8x1xf32>
    %84 = vector.broadcast %83 : vector<8x1xf32> to vector<8x224xf32>
    %85 = arith.mulf %82, %84 : vector<8x224xf32>
    %86 = arith.addf %81, %85 : vector<8x224xf32>
    %87 = vector.extract_strided_slice %52 {offsets = [0, 33], sizes = [8, 224], strides = [1, 1]} : vector<8x258xf32> to vector<8x224xf32>
    %88 = vector.extract_strided_slice %0 {offsets = [0, 16], sizes = [8, 1], strides = [1, 1]} : vector<8x36xf32> to vector<8x1xf32>
    %89 = vector.broadcast %88 : vector<8x1xf32> to vector<8x224xf32>
    %90 = arith.mulf %87, %89 : vector<8x224xf32>
    %91 = arith.addf %86, %90 : vector<8x224xf32>
    %92 = vector.extract_strided_slice %52 {offsets = [0, 34], sizes = [8, 224], strides = [1, 1]} : vector<8x258xf32> to vector<8x224xf32>
    %93 = vector.extract_strided_slice %0 {offsets = [0, 17], sizes = [8, 1], strides = [1, 1]} : vector<8x36xf32> to vector<8x1xf32>
    %94 = vector.broadcast %93 : vector<8x1xf32> to vector<8x224xf32>
    %95 = arith.mulf %92, %94 : vector<8x224xf32>
    %96 = arith.addf %91, %95 : vector<8x224xf32>
    %c0_6 = arith.constant 0 : index
    %c2 = arith.constant 2 : index
    %c0_7 = arith.constant 0 : index
    %97 = vector.load %arg1[%c0_6, %c2, %c0_7] : memref<1x4x258xf32, #tpu.memory_space<vmem>>, vector<1x1x258xf32>
    %98 = vector.shape_cast %97 : vector<1x1x258xf32> to vector<1x258xf32>
    %99 = vector.shape_cast %98 : vector<1x258xf32> to vector<1x258xf32>
    %100 = vector.broadcast %99 : vector<1x258xf32> to vector<8x258xf32>
    %101 = vector.extract_strided_slice %100 {offsets = [0, 0], sizes = [8, 224], strides = [1, 1]} : vector<8x258xf32> to vector<8x224xf32>
    %102 = vector.extract_strided_slice %0 {offsets = [0, 18], sizes = [8, 1], strides = [1, 1]} : vector<8x36xf32> to vector<8x1xf32>
    %103 = vector.broadcast %102 : vector<8x1xf32> to vector<8x224xf32>
    %104 = arith.mulf %101, %103 : vector<8x224xf32>
    %105 = vector.extract_strided_slice %100 {offsets = [0, 1], sizes = [8, 224], strides = [1, 1]} : vector<8x258xf32> to vector<8x224xf32>
    %106 = vector.extract_strided_slice %0 {offsets = [0, 19], sizes = [8, 1], strides = [1, 1]} : vector<8x36xf32> to vector<8x1xf32>
    %107 = vector.broadcast %106 : vector<8x1xf32> to vector<8x224xf32>
    %108 = arith.mulf %105, %107 : vector<8x224xf32>
    %109 = arith.addf %104, %108 : vector<8x224xf32>
    %110 = vector.extract_strided_slice %100 {offsets = [0, 2], sizes = [8, 224], strides = [1, 1]} : vector<8x258xf32> to vector<8x224xf32>
    %111 = vector.extract_strided_slice %0 {offsets = [0, 20], sizes = [8, 1], strides = [1, 1]} : vector<8x36xf32> to vector<8x1xf32>
    %112 = vector.broadcast %111 : vector<8x1xf32> to vector<8x224xf32>
    %113 = arith.mulf %110, %112 : vector<8x224xf32>
    %114 = arith.addf %109, %113 : vector<8x224xf32>
    %115 = vector.extract_strided_slice %100 {offsets = [0, 16], sizes = [8, 224], strides = [1, 1]} : vector<8x258xf32> to vector<8x224xf32>
    %116 = vector.extract_strided_slice %0 {offsets = [0, 21], sizes = [8, 1], strides = [1, 1]} : vector<8x36xf32> to vector<8x1xf32>
    %117 = vector.broadcast %116 : vector<8x1xf32> to vector<8x224xf32>
    %118 = arith.mulf %115, %117 : vector<8x224xf32>
    %119 = arith.addf %114, %118 : vector<8x224xf32>
    %120 = vector.extract_strided_slice %100 {offsets = [0, 17], sizes = [8, 224], strides = [1, 1]} : vector<8x258xf32> to vector<8x224xf32>
    %121 = vector.extract_strided_slice %0 {offsets = [0, 22], sizes = [8, 1], strides = [1, 1]} : vector<8x36xf32> to vector<8x1xf32>
    %122 = vector.broadcast %121 : vector<8x1xf32> to vector<8x224xf32>
    %123 = arith.mulf %120, %122 : vector<8x224xf32>
    %124 = arith.addf %119, %123 : vector<8x224xf32>
    %125 = vector.extract_strided_slice %100 {offsets = [0, 18], sizes = [8, 224], strides = [1, 1]} : vector<8x258xf32> to vector<8x224xf32>
    %126 = vector.extract_strided_slice %0 {offsets = [0, 23], sizes = [8, 1], strides = [1, 1]} : vector<8x36xf32> to vector<8x1xf32>
    %127 = vector.broadcast %126 : vector<8x1xf32> to vector<8x224xf32>
    %128 = arith.mulf %125, %127 : vector<8x224xf32>
    %129 = arith.addf %124, %128 : vector<8x224xf32>
    %130 = vector.extract_strided_slice %100 {offsets = [0, 32], sizes = [8, 224], strides = [1, 1]} : vector<8x258xf32> to vector<8x224xf32>
    %131 = vector.extract_strided_slice %0 {offsets = [0, 24], sizes = [8, 1], strides = [1, 1]} : vector<8x36xf32> to vector<8x1xf32>
    %132 = vector.broadcast %131 : vector<8x1xf32> to vector<8x224xf32>
    %133 = arith.mulf %130, %132 : vector<8x224xf32>
    %134 = arith.addf %129, %133 : vector<8x224xf32>
    %135 = vector.extract_strided_slice %100 {offsets = [0, 33], sizes = [8, 224], strides = [1, 1]} : vector<8x258xf32> to vector<8x224xf32>
    %136 = vector.extract_strided_slice %0 {offsets = [0, 25], sizes = [8, 1], strides = [1, 1]} : vector<8x36xf32> to vector<8x1xf32>
    %137 = vector.broadcast %136 : vector<8x1xf32> to vector<8x224xf32>
    %138 = arith.mulf %135, %137 : vector<8x224xf32>
    %139 = arith.addf %134, %138 : vector<8x224xf32>
    %140 = vector.extract_strided_slice %100 {offsets = [0, 34], sizes = [8, 224], strides = [1, 1]} : vector<8x258xf32> to vector<8x224xf32>
    %141 = vector.extract_strided_slice %0 {offsets = [0, 26], sizes = [8, 1], strides = [1, 1]} : vector<8x36xf32> to vector<8x1xf32>
    %142 = vector.broadcast %141 : vector<8x1xf32> to vector<8x224xf32>
    %143 = arith.mulf %140, %142 : vector<8x224xf32>
    %144 = arith.addf %139, %143 : vector<8x224xf32>
    %c0_8 = arith.constant 0 : index
    %c3 = arith.constant 3 : index
    %c0_9 = arith.constant 0 : index
    %145 = vector.load %arg1[%c0_8, %c3, %c0_9] : memref<1x4x258xf32, #tpu.memory_space<vmem>>, vector<1x1x258xf32>
    %146 = vector.shape_cast %145 : vector<1x1x258xf32> to vector<1x258xf32>
    %147 = vector.shape_cast %146 : vector<1x258xf32> to vector<1x258xf32>
    %148 = vector.broadcast %147 : vector<1x258xf32> to vector<8x258xf32>
    %149 = vector.extract_strided_slice %148 {offsets = [0, 0], sizes = [8, 224], strides = [1, 1]} : vector<8x258xf32> to vector<8x224xf32>
    %150 = vector.extract_strided_slice %0 {offsets = [0, 27], sizes = [8, 1], strides = [1, 1]} : vector<8x36xf32> to vector<8x1xf32>
    %151 = vector.broadcast %150 : vector<8x1xf32> to vector<8x224xf32>
    %152 = arith.mulf %149, %151 : vector<8x224xf32>
    %153 = vector.extract_strided_slice %148 {offsets = [0, 1], sizes = [8, 224], strides = [1, 1]} : vector<8x258xf32> to vector<8x224xf32>
    %154 = vector.extract_strided_slice %0 {offsets = [0, 28], sizes = [8, 1], strides = [1, 1]} : vector<8x36xf32> to vector<8x1xf32>
    %155 = vector.broadcast %154 : vector<8x1xf32> to vector<8x224xf32>
    %156 = arith.mulf %153, %155 : vector<8x224xf32>
    %157 = arith.addf %152, %156 : vector<8x224xf32>
    %158 = vector.extract_strided_slice %148 {offsets = [0, 2], sizes = [8, 224], strides = [1, 1]} : vector<8x258xf32> to vector<8x224xf32>
    %159 = vector.extract_strided_slice %0 {offsets = [0, 29], sizes = [8, 1], strides = [1, 1]} : vector<8x36xf32> to vector<8x1xf32>
    %160 = vector.broadcast %159 : vector<8x1xf32> to vector<8x224xf32>
    %161 = arith.mulf %158, %160 : vector<8x224xf32>
    %162 = arith.addf %157, %161 : vector<8x224xf32>
    %163 = vector.extract_strided_slice %148 {offsets = [0, 16], sizes = [8, 224], strides = [1, 1]} : vector<8x258xf32> to vector<8x224xf32>
    %164 = vector.extract_strided_slice %0 {offsets = [0, 30], sizes = [8, 1], strides = [1, 1]} : vector<8x36xf32> to vector<8x1xf32>
    %165 = vector.broadcast %164 : vector<8x1xf32> to vector<8x224xf32>
    %166 = arith.mulf %163, %165 : vector<8x224xf32>
    %167 = arith.addf %162, %166 : vector<8x224xf32>
    %168 = vector.extract_strided_slice %148 {offsets = [0, 17], sizes = [8, 224], strides = [1, 1]} : vector<8x258xf32> to vector<8x224xf32>
    %169 = vector.extract_strided_slice %0 {offsets = [0, 31], sizes = [8, 1], strides = [1, 1]} : vector<8x36xf32> to vector<8x1xf32>
    %170 = vector.broadcast %169 : vector<8x1xf32> to vector<8x224xf32>
    %171 = arith.mulf %168, %170 : vector<8x224xf32>
    %172 = arith.addf %167, %171 : vector<8x224xf32>
    %173 = vector.extract_strided_slice %148 {offsets = [0, 18], sizes = [8, 224], strides = [1, 1]} : vector<8x258xf32> to vector<8x224xf32>
    %174 = vector.extract_strided_slice %0 {offsets = [0, 32], sizes = [8, 1], strides = [1, 1]} : vector<8x36xf32> to vector<8x1xf32>
    %175 = vector.broadcast %174 : vector<8x1xf32> to vector<8x224xf32>
    %176 = arith.mulf %173, %175 : vector<8x224xf32>
    %177 = arith.addf %172, %176 : vector<8x224xf32>
    %178 = vector.extract_strided_slice %148 {offsets = [0, 32], sizes = [8, 224], strides = [1, 1]} : vector<8x258xf32> to vector<8x224xf32>
    %179 = vector.extract_strided_slice %0 {offsets = [0, 33], sizes = [8, 1], strides = [1, 1]} : vector<8x36xf32> to vector<8x1xf32>
    %180 = vector.broadcast %179 : vector<8x1xf32> to vector<8x224xf32>
    %181 = arith.mulf %178, %180 : vector<8x224xf32>
    %182 = arith.addf %177, %181 : vector<8x224xf32>
    %183 = vector.extract_strided_slice %148 {offsets = [0, 33], sizes = [8, 224], strides = [1, 1]} : vector<8x258xf32> to vector<8x224xf32>
    %184 = vector.extract_strided_slice %0 {offsets = [0, 34], sizes = [8, 1], strides = [1, 1]} : vector<8x36xf32> to vector<8x1xf32>
    %185 = vector.broadcast %184 : vector<8x1xf32> to vector<8x224xf32>
    %186 = arith.mulf %183, %185 : vector<8x224xf32>
    %187 = arith.addf %182, %186 : vector<8x224xf32>
    %188 = vector.extract_strided_slice %148 {offsets = [0, 34], sizes = [8, 224], strides = [1, 1]} : vector<8x258xf32> to vector<8x224xf32>
    %189 = vector.extract_strided_slice %0 {offsets = [0, 35], sizes = [8, 1], strides = [1, 1]} : vector<8x36xf32> to vector<8x1xf32>
    %190 = vector.broadcast %189 : vector<8x1xf32> to vector<8x224xf32>
    %191 = arith.mulf %188, %190 : vector<8x224xf32>
    %192 = arith.addf %187, %191 : vector<8x224xf32>
    %193 = arith.addf %48, %96 : vector<8x224xf32>
    %194 = arith.addf %193, %144 : vector<8x224xf32>
    %195 = arith.addf %194, %192 : vector<8x224xf32>
    %c0_10 = arith.constant 0 : index
    %c0_11 = arith.constant 0 : index
    %196 = vector.load %arg3[%c0_10, %c0_11] : memref<8x1xf32, #tpu.memory_space<vmem>>, vector<8x1xf32>
    %197 = vector.broadcast %196 : vector<8x1xf32> to vector<8x224xf32>
    %198 = arith.addf %195, %197 : vector<8x224xf32>
    %cst = arith.constant 0.000000e+00 : f32
    %199 = vector.broadcast %cst : f32 to vector<8x224xf32>
    %200 = arith.maximumf %198, %199 : vector<8x224xf32>
    %c0_12 = arith.constant 0 : index
    %c0_13 = arith.constant 0 : index
    %201 = vector.load %arg4[%c0_12, %c0_13] : memref<1x224xf32, #tpu.memory_space<vmem>>, vector<1x224xf32>
    %202 = vector.broadcast %201 : vector<1x224xf32> to vector<8x224xf32>
    %203 = arith.mulf %200, %202 : vector<8x224xf32>
    %cst_14 = arith.constant dense<0.000000e+00> : vector<8xf32>
    %204 = vector.multi_reduction <add>, %203, %cst_14 [1] : vector<8x224xf32> to vector<8xf32>
    %205 = vector.shape_cast %204 : vector<8xf32> to vector<8x1xf32>
    %206 = arith.mulf %203, %203 : vector<8x224xf32>
    %cst_15 = arith.constant dense<0.000000e+00> : vector<8xf32>
    %207 = vector.multi_reduction <add>, %206, %cst_15 [1] : vector<8x224xf32> to vector<8xf32>
    %208 = vector.shape_cast %207 : vector<8xf32> to vector<8x1xf32>
    %209 = tpu.concatenate %205, %208 in 1 : vector<8x1xf32>, vector<8x1xf32> -> vector<8x2xf32>
    %c0_16 = arith.constant 0 : index
    %c0_17 = arith.constant 0 : index
    %c0_18 = arith.constant 0 : index
    %210 = vector.load %arg5[%c0_16, %c0_17, %c0_18] : memref<1x8x2xf32, #tpu.memory_space<vmem>>, vector<1x8x2xf32>
    %211 = vector.shape_cast %210 : vector<1x8x2xf32> to vector<8x2xf32>
    %212 = vector.shape_cast %209 : vector<8x2xf32> to vector<1x8x2xf32>
    tpu.vector_store %arg5[%c0_16, %c0_17, %c0_18], %212 {strides = array<i32>} : memref<1x8x2xf32, #tpu.memory_space<vmem>>, vector<1x8x2xf32>,
    return
  }
  func.func @transform_0(%arg0: i32) -> (i32, i32, i32) {
    %c0_i32 = arith.constant 0 : i32
    %c0_i32_0 = arith.constant 0 : i32
    %c0_i32_1 = arith.constant 0 : i32
    return %arg0, %c0_i32, %c0_i32_0 : i32, i32, i32
  }
  func.func @transform_1(%arg0: i32) -> (i32, i32) {
    %c0_i32 = arith.constant 0 : i32
    %c0_i32_0 = arith.constant 0 : i32
    %c0_i32_1 = arith.constant 0 : i32
    return %c0_i32, %c0_i32_0 : i32, i32
  }
  func.func @transform_2(%arg0: i32) -> (i32, i32) {
    %c0_i32 = arith.constant 0 : i32
    %c0_i32_0 = arith.constant 0 : i32
    %c0_i32_1 = arith.constant 0 : i32
    return %c0_i32, %c0_i32_0 : i32, i32
  }
  func.func @transform_3(%arg0: i32) -> (i32, i32) {
    %c0_i32 = arith.constant 0 : i32
    %c0_i32_0 = arith.constant 0 : i32
    %c0_i32_1 = arith.constant 0 : i32
    return %c0_i32, %c0_i32_0 : i32, i32
  }
  func.func @transform_4(%arg0: i32) -> (i32, i32, i32) {
    %c0_i32 = arith.constant 0 : i32
    %c0_i32_0 = arith.constant 0 : i32
    %c0_i32_1 = arith.constant 0 : i32
    return %arg0, %c0_i32, %c0_i32_0 : i32, i32, i32
  }
}

</mosaic_0001>

<bundles_post_ra>
// kernel: sepconv_forward.3
= control target key start
LH: loop header
LB: loop body
LE: loop exit
PB: predicated region body
PF: predicated region fallthrough
CT: control target
= control target key end

     0   :  { %s1154_s18 = smov 0   ;;  %s1546_s0 = inlined_call_operand.vmem [shape: f32[2,4,258], index: 0, kind: input, shape index: {}]   ;;  %s1547_s1 = inlined_call_operand.vmem [shape: f32[8,36], index: 1, kind: input, shape index: {}]   ;;  %s1548_s2 = inlined_call_operand.vmem [shape: f32[8,1], index: 2, kind: input, shape index: {}]   ;;  %s1549_s3 = inlined_call_operand.vmem [shape: f32[8,1], index: 3, kind: input, shape index: {}]   ;;  %s1550_s4 = inlined_call_operand.vmem [shape: f32[8,1], index: 4, kind: input, shape index: {}]   ;;  %s1551_s5 = inlined_call_operand.vmem [shape: f32[2,8,224], index: 5, kind: output, shape index: {}]  }
   0x1 LB: > { %s967_s19 = sadd.s32 4294967295, %s1078_s18   ;;  %p971_p0 = scmp.ge.s32.totalorder %s1078_s18, 1  ;;  %s1078_s18 = sphi %s1154_s18, %s15_s18  }
   0x2   : > { %p187_p1 = scmp.lt.s32.totalorder %s1078_s18, 3 }
   0x4   : > { %p188_p2 = pnand %p971_p0, %p187_p1 }
   0x5   : > { %p215_p3 = scmp.lt.s32.totalorder (!%p188_p2), %s967_s19, 1  ;;  %s1094_s26 = smov (!%p188_p2), 126  }
   0x6   : > { %191 = sbr.rel (%p188_p2) target bundleno = 1153 (0x481), region = 40  ;;  %s1095_s27 = smov (!%p188_p2), 112  }
   0x7   : > { %s1096_s28 = smov (!%p188_p2), 111   ;;  %s1097_s29 = smov (!%p188_p2), 127  }
   0x8   : > { %s1098_s30 = smov (!%p188_p2), 110   ;;  %s1099_s6 = smov (!%p188_p2), 96  }
   0x9   : > { %s1100_s7 = smov (!%p188_p2), 95   ;;  %s1101_s8 = smov (!%p188_p2), 94  }
   0xb   : > { %v1165_v0 = vld [vmem:[%s1547_s1] sm:$0xff]  ;;  %v1080_v1 = vmov 1   ;;  %v1081_v2 = vmov 2   ;;  %v1082_v3 = vmov 11   ;;  %v1083_v4 = vmov 3   ;;  %s1553_s19 = smov (!%p215_p3, %s967_s19), 1 }
   0xc   : > { %1034 = vset.pattern.permute.xlu0 %v1080_v1  ;;  %1035 = vset.pattern.permute.xlu2 %v1081_v2  ;;  %v1084_v5 = vmov 12   ;;  %v1085_v6 = vmov 8   ;;  %v1086_v7 = vmov 4   ;;  %v1087_v8 = vmov 13   ;;  %s981_s22 = smul.u32 12, %s1553_s19  ;;  %s980_s15 = sshll.u32 %s1553_s19, 4 }
   0xd   : > { %240 = vperm.xlu0 %1034, %v1165_v0   ;;  %258 = vperm.xlu2 %1035, %v1165_v0   ;;  %v1088_v9 = vmov 10   ;;  %v1089_v10 = vmov 5   ;;  %v1090_v11 = vmov 14   ;;  %v1091_v12 = vmov 6   ;;  %s224_s20 = scalar_lea.vmem %s1551_s5, %s980_s15 }
   0xe   : > { %1044 = vset.pattern.permute.xlu1 %v1082_v3  ;;  %v1092_v13 = vmov 7   ;;  %s1190_s25 = scalar_lea.vmem %s1546_s0, %s981_s22  ;;  %v1093_v15 = vmov 9   ;;  %v1102_v57 = vmov 15   ;;  %v1103_v2 = vmov 16  }
   0xf   : > { %426 = vperm.xlu1 %1044, %v1165_v0   ;;  %v1193_v14 = vld [vmem:[%s1190_s25] ss:$4 sm:$0x7]  ;;  %v1220_v35 = vld [vmem:[%s1190_s25 + $0x1] ss:$4 sm:$0x7] }
  0x10   : > { %v1197_v16 = vperm.slane %v1193_v14, 0  ;;  %v1209_v27 = vperm.slane %v1193_v14, 1  ;;  %v347_v32 = vperm.slane %v1193_v14, 2  ;;  %v1225_v38 = vperm.slane %v1220_v35, 1 }
  0x11   : > { %v1242_v50 = vperm.slane %v1220_v35, 0  ;;  %vm269_vm0 = vcmask 1031168   ;;  %vm287_vm1 = vcmask 916480   ;;  %vm305_vm2 = vcmask 908288  }
  0x12   : > { %vm365_vm3 = vcmask 777216   ;;  %vm388_vm4 = vcmask 769024   ;;  %vm251_vm5 = vcmask 1039360   ;;  %vm323_vm6 = vcmask 900096  }
  0x13   : > { %vm341_vm7 = vcmask 785408  }
  0x15   : > { %1036 = vset.pattern.permute.xlu2 %v1083_v4  ;;  %1041 = vset.pattern.permute.xlu0 %v1085_v6 }
  0x16   : > { %276 = vperm.xlu2 %1036, %v1165_v0   ;;  %373 = vperm.xlu0 %1041, %v1165_v0  }
  0x17   : > { %1045 = vset.pattern.permute.xlu1 %v1084_v5 }
  0x18   : > { %443 = vperm.xlu1 %1045, %v1165_v0  }
  0x1e   : > { %1037 = vset.pattern.permute.xlu2 %v1086_v7  ;;  %1043 = vset.pattern.permute.xlu0 %v1088_v9 }
  0x1f   : > { %294 = vperm.xlu2 %1037, %v1165_v0   ;;  %409 = vperm.xlu0 %1043, %v1165_v0  }
  0x20   : > { %1046 = vset.pattern.permute.xlu1 %v1087_v8 }
  0x21   : > { %460 = vperm.xlu1 %1046, %v1165_v0  }
  0x27   : > { %1038 = vset.pattern.permute.xlu2 %v1089_v10 }
  0x28   : > { %312 = vperm.xlu2 %1038, %v1165_v0  }
  0x29   : > { %1047 = vset.pattern.permute.xlu1 %v1090_v11 }
  0x2a   : > { %477 = vperm.xlu1 %1047, %v1165_v0  }
  0x30   : > { %1039 = vset.pattern.permute.xlu2 %v1091_v12 }
  0x31   : > { %330 = vperm.xlu2 %1039, %v1165_v0  }
  0x32   : > { %1048 = vset.pattern.permute.xlu1 %v1102_v57 }
  0x39   : > { %1040 = vset.pattern.permute.xlu2 %v1092_v13 }
  0x3a   : > { %350 = vperm.xlu2 %1040, %v1165_v0  }
  0x42   : > { %1042 = vset.pattern.permute.xlu2 %v1093_v15 }
  0x43   : > { %403 = vperm.xlu2 %1042, %v1165_v0  }
  0x67   : > { %v259_v17 = vpop.permute.xlu2 %258 }
  0x68   : > { %v261_v18 = vmul.f32 %v259_v17, %v1197_v16  ;;  %v262_v31 = vmul.f32 %v259_v17, %v1209_v27 }
  0x6a   : > { %265 = vrot.lane.b32.xlu2 %v261_v18, %s1094_s26 }
  0x70   : > { %v277_v19 = vpop.permute.xlu2 %276 }
  0x71   : > { %v279_v20 = vmul.f32 %v277_v19, %v1197_v16  ;;  %v280_v39 = vmul.f32 %v277_v19, %v1209_v27 }
  0x73   : > { %283 = vrot.lane.b32.xlu0 %v279_v20, %s1095_s27 }
  0x79   : > { %v295_v21 = vpop.permute.xlu2 %294 }
  0x7a   : > { %v297_v22 = vmul.f32 %v295_v21, %v1197_v16  ;;  %v298_v44 = vmul.f32 %v295_v21, %v1209_v27 }
  0x7c   : > { %301 = vrot.lane.b32.xlu0 %v297_v22, %s1096_s28 }
  0x7f   : > { %v241_v23 = vpop.permute.xlu0 %240 }
  0x80   : > { %v243_v24 = vmul.f32 %v241_v23, %v1197_v16  ;;  %v244_v28 = vmul.f32 %v241_v23, %v1209_v27 }
  0x81   : > { %v427_v33 = vpop.permute.xlu1 %426 }
  0x82   : > { %247 = vrot.lane.b32.xlu1 %v243_v24, %s1097_s29  ;;  %v313_v25 = vpop.permute.xlu2 %312  ;;  %v430_v41 = vmul.f32 %v427_v33, %v1225_v38  ;;  %v429_v51 = vmul.f32 %v427_v33, %v1242_v50 }
  0x83   : > { %v315_v26 = vmul.f32 %v313_v25, %v1197_v16  ;;  %v316_v49 = vmul.f32 %v313_v25, %v1209_v27 }
  0x85   : > { %319 = vrot.lane.b32.xlu0 %v315_v26, %s1098_s30 }
  0x88   : > { %v374_v40 = vpop.permute.xlu0 %373 }
  0x89   : > { %v377_v42 = vmul.f32 %v374_v40, %v1209_v27  ;;  %v376_v60 = vmul.f32 %v374_v40, %v1197_v16  ;;  %v378_v62 = vmul.f32 %v374_v40, %v347_v32 }
  0x8a   : > { %249 = vrot.lane.b32.xlu1 %v244_v28, %s1097_s29  ;;  %v444_v43 = vpop.permute.xlu1 %443 }
  0x8b   : > { %v331_v29 = vpop.permute.xlu2 %330  ;;  %v447_v46 = vmul.f32 %v444_v43, %v1225_v38  ;;  %v446_v55 = vmul.f32 %v444_v43, %v1242_v50 }
  0x8c   : > { %v333_v30 = vmul.f32 %v331_v29, %v1197_v16  ;;  %v334_v53 = vmul.f32 %v331_v29, %v1209_v27 }
  0x8e   : > { %337 = vrot.lane.b32.xlu0 %v333_v30, %s1099_s6 }
  0x91   : > { %v410_v45 = vpop.permute.xlu0 %409 }
  0x92   : > { %267 = vrot.lane.b32.xlu1 %v262_v31, %s1094_s26  ;;  %v413_v47 = vmul.f32 %v410_v45, %v1225_v38  ;;  %v412_v63 = vmul.f32 %v410_v45, %v1242_v50 }
  0x93   : > { %v461_v48 = vpop.permute.xlu1 %460 }
  0x94   : > { %v351_v34 = vpop.permute.xlu2 %350  ;;  %v464_v52 = vmul.f32 %v461_v48, %v1225_v38  ;;  %v463_v59 = vmul.f32 %v461_v48, %v1242_v50 }
  0x95   : > { %v353_v36 = vmul.f32 %v351_v34, %v1197_v16  ;;  %v355_v37 = vmul.f32 %v351_v34, %v347_v32  ;;  %v354_v58 = vmul.f32 %v351_v34, %v1209_v27 }
  0x97   : > { %359 = vrot.lane.b32.xlu0 %v353_v36, %s1100_s7  ;;  %363 = vrot.lane.b32.xlu2 %v355_v37, %s1100_s7 }
  0x9a   : > { %285 = vrot.lane.b32.xlu1 %v280_v39, %s1095_s27 }
  0x9c   : > { %v478_v54 = vpop.permute.xlu1 %477 }
  0x9d   : > { %v481_v56 = vmul.f32 %v478_v54, %v1225_v38  ;;  %v480_v61 = vmul.f32 %v478_v54, %v1242_v50  ;;  %v404_v1 = vpop.permute.xlu2 %403 }
  0x9e   : > { %v407_v12 = vmul.f32 %v404_v1, %v1225_v38  ;;  %v406_v45 = vmul.f32 %v404_v1, %v1242_v50 }
  0x9f   : > { %435 = vrot.lane.b32.xlu0 %v430_v41, %s1094_s26  ;;  %384 = vrot.lane.b32.xlu2 %v377_v42, %s1101_s8  ;;  %v1104_v42 = vmov 17  }
  0xa0   : > { %1050 = vset.pattern.permute.xlu2 %v1104_v42 }
  0xa2   : > { %303 = vrot.lane.b32.xlu1 %v298_v44, %s1096_s28 }
  0xa7   : > { %452 = vrot.lane.b32.xlu0 %v447_v46, %s1095_s27  ;;  %418 = vrot.lane.b32.xlu2 %v413_v47, %s1097_s29 }
  0xaa   : > { %321 = vrot.lane.b32.xlu1 %v316_v49, %s1098_s30 }
  0xaf   : > { %469 = vrot.lane.b32.xlu0 %v464_v52, %s1096_s28  ;;  %433 = vrot.lane.b32.xlu2 %v429_v51, %s1094_s26 }
  0xb2   : > { %339 = vrot.lane.b32.xlu1 %v334_v53, %s1099_s6 }
  0xb7   : > { %486 = vrot.lane.b32.xlu0 %v481_v56, %s1098_s30  ;;  %450 = vrot.lane.b32.xlu2 %v446_v55, %s1095_s27  ;;  %v510_v56 = vperm.slane %v1220_v35, 2 }
  0xba   : > { %361 = vrot.lane.b32.xlu1 %v354_v58, %s1100_s7 }
  0xbf   : > { %467 = vrot.lane.b32.xlu2 %v463_v59, %s1096_s28 }
  0xc2   : > { %382 = vrot.lane.b32.xlu1 %v376_v60, %s1101_s8 }
  0xc4   : > { %v1270_v4 = vpop.permute.xlu2 %265 }
  0xc7   : > { %484 = vrot.lane.b32.xlu2 %v480_v61, %s1098_s30 }
  0xca   : > { %386 = vrot.lane.b32.xlu1 %v378_v62, %s1101_s8  ;;  %v1105_v62 = vmov 19  }
  0xd2   : > { %416 = vrot.lane.b32.xlu1 %v412_v63, %s1097_s29 }
  0xda   : > { %494 = vperm.xlu1 %1048, %v1165_v0  }
  0xe2   : > { %1049 = vset.pattern.permute.xlu1 %v1103_v2 }
  0xe3   : > { %513 = vperm.xlu1 %1049, %v1165_v0  }
  0xe5   : > { %v1268_v3 = vpop.permute.xlu0 %283 }
  0xeb   : > { %1052 = vset.pattern.permute.xlu1 %v1105_v62 }
  0xee   : > { %v1272_v5 = vpop.permute.xlu0 %301 }
  0xf1   : > { %v364_v6 = vpop.permute.xlu2 %363 }
  0xf4   : > { %v1274_v7 = vpop.permute.xlu1 %247 }
  0xf7   : > { %v1276_v8 = vpop.permute.xlu0 %319 }
  0xf9   : > { %v385_v10 = vpop.permute.xlu2 %384 }
  0xfc   : > { %v1278_v9 = vpop.permute.xlu1 %249 }
 0x100   : > { %v1280_v11 = vpop.permute.xlu0 %337 }
 0x101   : > { %v419_v14 = vpop.permute.xlu2 %418 }
 0x102   : > { %v424_v15 = vadd.f32 %v419_v14, %v407_v12 }
 0x104   : > { %v1283_v13 = vpop.permute.xlu1 %267 }
 0x109   : > { %v360_v17 = vpop.permute.xlu0 %359  ;;  %v434_v19 = vpop.permute.xlu2 %433 }
 0x10c   : > { %v1285_v18 = vpop.permute.xlu1 %285 }
 0x111   : > { %v436_v20 = vpop.permute.xlu0 %435  ;;  %v451_v24 = vpop.permute.xlu2 %450 }
 0x112   : > { %v441_v21 = vadd.f32 %v436_v20, %v424_v15  ;;  %v437_v22 = vsel %vm269_vm0, %v434_v19, %v436_v20 }
 0x114   : > { %v1288_v23 = vpop.permute.xlu1 %303 }
 0x119   : > { %v453_v25 = vpop.permute.xlu0 %452  ;;  %v468_v30 = vpop.permute.xlu2 %467 }
 0x11a   : > { %v458_v26 = vadd.f32 %v453_v25, %v441_v21  ;;  %v454_v28 = vsel %vm287_vm1, %v451_v24, %v453_v25  ;;  %v1106_v25 = vmov 18  }
 0x11b   : > { %1051 = vset.pattern.permute.xlu0 %v1106_v25  ;;  %v1114_v25 = vmov 28  }
 0x11c   : > { %v1291_v29 = vpop.permute.xlu1 %321 }
 0x121   : > { %v470_v31 = vpop.permute.xlu0 %469  ;;  %v485_v61 = vpop.permute.xlu2 %484 }
 0x122   : > { %v475_v32 = vadd.f32 %v470_v31, %v458_v26  ;;  %v471_v33 = vsel %vm305_vm2, %v468_v30, %v470_v31  ;;  %v1107_v26 = vmov 20  }
 0x124   : > { %v1294_v34 = vpop.permute.xlu1 %339 }
 0x129   : > { %v487_v35 = vpop.permute.xlu0 %486 }
 0x12a   : > { %v488_v15 = vsel %vm323_vm6, %v485_v61, %v487_v35 }
 0x12c   : > { %v362_v36 = vpop.permute.xlu1 %361 }
 0x12d   : > { %v1297_v37 = vsel %vm365_vm3, %v360_v17, %v362_v36  ;;  %v1300_v39 = vsel %vm365_vm3, %v362_v36, %v364_v6 }
 0x134   : > { %v383_v40 = vpop.permute.xlu1 %382 }
 0x135   : > { %v1303_v41 = vsel %vm388_vm4, %v383_v40, %v385_v10 }
 0x13c   : > { %v387_v43 = vpop.permute.xlu1 %386 }
 0x13d   : > { %v1306_v44 = vsel %vm388_vm4, %v385_v10, %v387_v43 }
 0x144   : > { %v417_v46 = vpop.permute.xlu1 %416 }
 0x145   : > { %v420_v47 = vsel %vm251_vm5, %v417_v46, %v419_v14  ;;  %v492_v14 = vadd.f32 %v487_v35, %v475_v32 }
 0x146   : > { %v423_v48 = vadd.f32 %v420_v47, %v406_v45  ;;  %v1337_v45 = vld [vmem:[%s1190_s25 + $0x2] ss:$4 sm:$0x7] }
 0x147   : > { %v1342_v47 = vperm.slane %v1337_v45, 0 }
 0x148   : > { %v440_v49 = vadd.f32 %v437_v22, %v423_v48  ;;  %v1345_v48 = vperm.slane %v1337_v45, 1 }
 0x14a   : > { %v457_v51 = vadd.f32 %v454_v28, %v440_v49 }
 0x14c   : > { %v474_v52 = vadd.f32 %v471_v33, %v457_v51  ;;  %v495_v53 = vpop.permute.xlu1 %494 }
 0x14d   : > { %v497_v54 = vmul.f32 %v495_v53, %v1242_v50  ;;  %v498_v55 = vmul.f32 %v495_v53, %v1225_v38  ;;  %v1108_v53 = vmov 21  }
 0x14e   : > { %v491_v17 = vadd.f32 %v488_v15, %v474_v52 }
 0x14f   : > { %503 = vrot.lane.b32.xlu0 %v498_v55, %s1099_s6  ;;  %501 = vrot.lane.b32.xlu2 %v497_v54, %s1099_s6  ;;  %v1109_v54 = vmov 22   ;;  %v1110_v55 = vmov 23  }
 0x155   : > { %v514_v57 = vpop.permute.xlu1 %513 }
 0x156   : > { %v516_v58 = vmul.f32 %v514_v57, %v1242_v50  ;;  %v517_v59 = vmul.f32 %v514_v57, %v1225_v38  ;;  %v518_v60 = vmul.f32 %v514_v57, %v510_v56  ;;  %v1112_v57 = vmov 25  }
 0x158   : > { %526 = vrot.lane.b32.xlu1 %v518_v60, %s1100_s7  ;;  %524 = vrot.lane.b32.xlu0 %v517_v59, %s1100_s7 }
 0x159   : > { %522 = vrot.lane.b32.xlu2 %v516_v58, %s1100_s7 }
 0x161   : > { %535 = vperm.xlu2 %1050, %v1165_v0  }
 0x169   : > { %1053 = vset.pattern.permute.xlu2 %v1107_v26  ;;  %v1115_v26 = vmov 31  }
 0x1a9   : > { %v502_v63 = vpop.permute.xlu2 %501 }
 0x1b3   : > { %v523_v1 = vpop.permute.xlu2 %522 }
 0x1bb   : > { %v536_v2 = vpop.permute.xlu2 %535 }
 0x1bc   : > { %v538_v6 = vmul.f32 %v536_v2, %v1242_v50  ;;  %v539_v10 = vmul.f32 %v536_v2, %v1225_v38  ;;  %v540_v12 = vmul.f32 %v536_v2, %v510_v56  ;;  %v1111_v56 = vmov 24  }
 0x1bd   : > { %v1113_v2 = vmov 26  }
 0x1be   : > { %548 = vrot.lane.b32.xlu2 %v540_v12, %s1101_s8  ;;  %546 = vrot.lane.b32.xlu1 %v539_v10, %s1101_s8 }
 0x1bf   : > { %544 = vrot.lane.b32.xlu0 %v538_v6, %s1101_s8 }
 0x1c1   : > { %v504_v19 = vpop.permute.xlu0 %503 }
 0x1c2   : > { %v505_v20 = vsel %vm341_vm7, %v502_v63, %v504_v19  ;;  %v509_v21 = vadd.f32 %v504_v19, %v492_v14 }
 0x1c3   : > { %v508_v50 = vadd.f32 %v505_v20, %v491_v17 }
 0x1c6   : > { %570 = vperm.xlu1 %1052, %v1165_v0  }
 0x1c7   : > { %564 = vperm.xlu0 %1051, %v1165_v0  }
 0x1ca   : > { %v525_v38 = vpop.permute.xlu0 %524  ;;  %v527_v28 = vpop.permute.xlu1 %526 }
 0x1cb   : > { %v528_v22 = vsel %vm365_vm3, %v523_v1, %v525_v38  ;;  %v529_v30 = vsel %vm365_vm3, %v525_v38, %v527_v28  ;;  %v1116_v28 = vmov 0  }
 0x1cc   : > { %v532_v24 = vadd.f32 %v528_v22, %v508_v50  ;;  %v533_v31 = vadd.f32 %v529_v30, %v509_v21  ;;  %v671_v21 = vperm.slane %v1337_v45, 2  ;;  %v1119_v45 = vmov 30  }
 0x1cf   : > { %1059 = vset.pattern.permute.xlu0 %v1113_v2 }
 0x218   : > { %v549_v32 = vpop.permute.xlu2 %548 }
 0x230   : > { %v547_v33 = vpop.permute.xlu1 %546 }
 0x231   : > { %v551_v36 = vsel %vm388_vm4, %v547_v33, %v549_v32  ;;  %v545_v40 = vpop.permute.xlu0 %544 }
 0x232   : > { %v1333_v42 = vadd.f32 %v551_v36, %v533_v31  ;;  %v550_v43 = vsel %vm388_vm4, %v545_v40, %v547_v33 }
 0x233   : > { %v1339_v46 = vadd.f32 %v550_v43, %v532_v24 }
 0x238   : > { %v571_v49 = vpop.permute.xlu1 %570 }
 0x239   : > { %v573_v51 = vmul.f32 %v571_v49, %v1342_v47  ;;  %v574_v52 = vmul.f32 %v571_v49, %v1345_v48  ;;  %v565_v30 = vpop.permute.xlu0 %564 }
 0x23a   : > { %v567_v32 = vmul.f32 %v565_v30, %v1342_v47 }
 0x23b   : > { %579 = vrot.lane.b32.xlu1 %v574_v52, %s1097_s29  ;;  %577 = vrot.lane.b32.xlu2 %v573_v51, %s1097_s29  ;;  %v568_v51 = vmul.f32 %v565_v30, %v1345_v48 }
 0x243   : > { %587 = vperm.xlu2 %1053, %v1165_v0  }
 0x24b   : > { %1054 = vset.pattern.permute.xlu2 %v1108_v53 }
 0x24c   : > { %604 = vperm.xlu2 %1054, %v1165_v0  }
 0x254   : > { %1055 = vset.pattern.permute.xlu2 %v1109_v54 }
 0x255   : > { %621 = vperm.xlu2 %1055, %v1165_v0  }
 0x25d   : > { %1056 = vset.pattern.permute.xlu2 %v1110_v55 }
 0x25e   : > { %638 = vperm.xlu2 %1056, %v1165_v0  }
 0x266   : > { %1057 = vset.pattern.permute.xlu2 %v1111_v56 }
 0x267   : > { %655 = vperm.xlu2 %1057, %v1165_v0  }
 0x26f   : > { %1058 = vset.pattern.permute.xlu2 %v1112_v57 }
 0x270   : > { %674 = vperm.xlu2 %1058, %v1165_v0  }
 0x295   : > { %v578_v58 = vpop.permute.xlu2 %577 }
 0x29d   : > { %v588_v59 = vpop.permute.xlu2 %587 }
 0x29e   : > { %v590_v60 = vmul.f32 %v588_v59, %v1342_v47  ;;  %v591_v61 = vmul.f32 %v588_v59, %v1345_v48 }
 0x2a0   : > { %596 = vrot.lane.b32.xlu1 %v591_v61, %s1094_s26  ;;  %594 = vrot.lane.b32.xlu0 %v590_v60, %s1094_s26 }
 0x2a6   : > { %v605_v62 = vpop.permute.xlu2 %604 }
 0x2a7   : > { %v607_v63 = vmul.f32 %v605_v62, %v1342_v47  ;;  %v608_v1 = vmul.f32 %v605_v62, %v1345_v48 }
 0x2a9   : > { %613 = vrot.lane.b32.xlu1 %v608_v1, %s1095_s27  ;;  %611 = vrot.lane.b32.xlu0 %v607_v63, %s1095_s27 }
 0x2ad   : > { %v580_v31 = vpop.permute.xlu1 %579 }
 0x2ae   : > { %v581_v33 = vsel %vm251_vm5, %v578_v58, %v580_v31  ;;  %v585_v53 = vadd.f32 %v580_v31, %v568_v51 }
 0x2af   : > { %v622_v35 = vpop.permute.xlu2 %621  ;;  %v584_v36 = vadd.f32 %v581_v33, %v567_v32  ;;  %v1411_v33 = vld [vmem:[%s1190_s25 + $0x3] ss:$4 sm:$0x7] }
 0x2b0   : > { %v624_v6 = vmul.f32 %v622_v35, %v1342_v47  ;;  %v625_v10 = vmul.f32 %v622_v35, %v1345_v48  ;;  %v1117_v35 = vmov 27  }
 0x2b1   : > { %1060 = vset.pattern.permute.xlu2 %v1117_v35 }
 0x2b2   : > { %630 = vrot.lane.b32.xlu1 %v625_v10, %s1096_s28  ;;  %628 = vrot.lane.b32.xlu0 %v624_v6, %s1096_s28 }
 0x2b8   : > { %v639_v12 = vpop.permute.xlu2 %638 }
 0x2b9   : > { %v641_v14 = vmul.f32 %v639_v12, %v1342_v47  ;;  %v642_v15 = vmul.f32 %v639_v12, %v1345_v48 }
 0x2bb   : > { %647 = vrot.lane.b32.xlu1 %v642_v15, %s1098_s30  ;;  %645 = vrot.lane.b32.xlu0 %v641_v14, %s1098_s30 }
 0x2c1   : > { %v656_v17 = vpop.permute.xlu2 %655 }
 0x2c2   : > { %v658_v19 = vmul.f32 %v656_v17, %v1342_v47  ;;  %v659_v20 = vmul.f32 %v656_v17, %v1345_v48 }
 0x2c4   : > { %664 = vrot.lane.b32.xlu1 %v659_v20, %s1099_s6  ;;  %662 = vrot.lane.b32.xlu0 %v658_v19, %s1099_s6 }
 0x2ca   : > { %v675_v50 = vpop.permute.xlu2 %674 }
 0x2cb   : > { %v677_v38 = vmul.f32 %v675_v50, %v1342_v47  ;;  %v678_v22 = vmul.f32 %v675_v50, %v1345_v48  ;;  %v679_v24 = vmul.f32 %v675_v50, %v671_v21 }
 0x2cd   : > { %687 = vrot.lane.b32.xlu2 %v679_v24, %s1100_s7  ;;  %685 = vrot.lane.b32.xlu1 %v678_v22, %s1100_s7 }
 0x2ce   : > { %683 = vrot.lane.b32.xlu0 %v677_v38, %s1100_s7  ;;  %v1118_v38 = vmov 29  }
 0x2cf   : > { %1062 = vset.pattern.permute.xlu1 %v1118_v38 }
 0x2d6   : > { %696 = vperm.xlu0 %1059, %v1165_v0  }
 0x2de   : > { %1061 = vset.pattern.permute.xlu0 %v1114_v25 }
 0x2df   : > { %731 = vperm.xlu0 %1061, %v1165_v0  }
 0x2e7   : > { %1064 = vset.pattern.permute.xlu0 %v1115_v26 }
 0x2e8   : > { %782 = vperm.xlu0 %1064, %v1165_v0  }
 0x2f0   : > { %1065 = vset.pattern.permute.xlu0 %v1116_v28 }
 0x2f1   : > { %234 = vperm.xlu0 %1065, %v1165_v0  }
 0x312   : > { %v597_v40 = vpop.permute.xlu1 %596  ;;  %v595_v43 = vpop.permute.xlu0 %594 }
 0x313   : > { %v598_v49 = vsel %vm269_vm0, %v595_v43, %v597_v40  ;;  %v602_v54 = vadd.f32 %v597_v40, %v585_v53  ;;  %v1418_v43 = vperm.slane %v1411_v33, 0 }
 0x314   : > { %v601_v52 = vadd.f32 %v598_v49, %v584_v36 }
 0x31b   : > { %v614_v55 = vpop.permute.xlu1 %613  ;;  %v612_v56 = vpop.permute.xlu0 %611 }
 0x31c   : > { %v619_v57 = vadd.f32 %v614_v55, %v602_v54  ;;  %v615_v59 = vsel %vm287_vm1, %v612_v56, %v614_v55  ;;  %v252_v54 = vsel %vm251_vm5, %v1274_v7, %v1278_v9  ;;  %v306_v7 = vsel %vm305_vm2, %v1272_v5, %v1288_v23 }
 0x31d   : > { %v618_v60 = vadd.f32 %v615_v59, %v601_v52  ;;  %v342_v5 = vsel %vm341_vm7, %v1280_v11, %v1294_v34 }
 0x324   : > { %v631_v61 = vpop.permute.xlu1 %630  ;;  %v629_v62 = vpop.permute.xlu0 %628 }
 0x325   : > { %v636_v63 = vadd.f32 %v631_v61, %v619_v57  ;;  %v632_v58 = vsel %vm305_vm2, %v629_v62, %v631_v61  ;;  %v270_v57 = vsel %vm269_vm0, %v1270_v4, %v1283_v13  ;;  %v1120_v62 = vmov 32  }
 0x326   : > { %v635_v1 = vadd.f32 %v632_v58, %v618_v60 }
 0x32d   : > { %v648_v2 = vpop.permute.xlu1 %647  ;;  %v646_v6 = vpop.permute.xlu0 %645 }
 0x32e   : > { %v653_v10 = vadd.f32 %v648_v2, %v636_v63  ;;  %v649_v12 = vsel %vm323_vm6, %v646_v6, %v648_v2  ;;  %v1122_v2 = vmov 34   ;;  %v1123_v6 = vmov 35  }
 0x32f   : > { %v652_v14 = vadd.f32 %v649_v12, %v635_v1 }
 0x336   : > { %v665_v15 = vpop.permute.xlu1 %664  ;;  %v663_v17 = vpop.permute.xlu0 %662 }
 0x337   : > { %v1397_v19 = vadd.f32 %v665_v15, %v653_v10  ;;  %v666_v20 = vsel %vm341_vm7, %v663_v17, %v665_v15 }
 0x338   : > { %v669_v50 = vadd.f32 %v666_v20, %v652_v14 }
 0x33f   : > { %v1400_v22 = vpop.permute.xlu1 %685 }
 0x340   : > { %v684_v24 = vpop.permute.xlu0 %683 }
 0x341   : > { %v689_v25 = vsel %vm365_vm3, %v684_v24, %v1400_v22 }
 0x342   : > { %v1404_v26 = vadd.f32 %v689_v25, %v669_v50 }
 0x348   : > { %v697_v30 = vpop.permute.xlu0 %696 }
 0x349   : > { %v699_v31 = vmul.f32 %v697_v30, %v1342_v47  ;;  %v700_v32 = vmul.f32 %v697_v30, %v1345_v48  ;;  %v701_v36 = vmul.f32 %v697_v30, %v671_v21  ;;  %v1421_v47 = vperm.slane %v1411_v33, 1 }
 0x34b   : > { %707 = vrot.lane.b32.xlu2 %v700_v32, %s1101_s8  ;;  %705 = vrot.lane.b32.xlu1 %v699_v31, %s1101_s8 }
 0x351   : > { %v732_v40 = vpop.permute.xlu0 %731 }
 0x352   : > { %v734_v48 = vmul.f32 %v732_v40, %v1418_v43  ;;  %v735_v49 = vmul.f32 %v732_v40, %v1421_v47 }
 0x353   : > { %725 = vperm.xlu2 %1060, %v1165_v0   ;;  %709 = vrot.lane.b32.xlu1 %v701_v36, %s1101_s8 }
 0x35a   : > { %v1425_v51 = vpop.permute.xlu0 %782 }
 0x35b   : > { %740 = vrot.lane.b32.xlu2 %v735_v49, %s1097_s29  ;;  %738 = vrot.lane.b32.xlu1 %v734_v48, %s1097_s29  ;;  %v786_v20 = vmul.f32 %v1425_v51, %v1421_v47 }
 0x35c   : > { %1063 = vset.pattern.permute.xlu2 %v1119_v45  ;;  %v785_v45 = vmul.f32 %v1425_v51, %v1418_v43 }
 0x363   : > { %748 = vperm.xlu1 %1062, %v1165_v0   ;;  %v235_v21 = vpop.permute.xlu0 %234  ;;  %765 = vperm.xlu2 %1063, %v1165_v0  }
 0x364   : > { %v237_v52 = vmul.f32 %v235_v21, %v1197_v16  ;;  %v238_v53 = vmul.f32 %v235_v21, %v1209_v27  ;;  %v288_v16 = vsel %vm287_vm1, %v1268_v3, %v1285_v18  ;;  %v324_v3 = vsel %vm323_vm6, %v1276_v8, %v1291_v29 }
 0x366   : > { %v255_v55 = vadd.f32 %v252_v54, %v237_v52  ;;  %v256_v56 = vadd.f32 %v1278_v9, %v238_v53  ;;  %v1121_v9 = vmov 33  }
 0x368   : > { %v273_v59 = vadd.f32 %v270_v57, %v255_v55  ;;  %v274_v60 = vadd.f32 %v1283_v13, %v256_v56 }
 0x36a   : > { %v291_v61 = vadd.f32 %v288_v16, %v273_v59  ;;  %v292_v27 = vadd.f32 %v1285_v18, %v274_v60  ;;  %v832_v16 = vperm.slane %v1411_v33, 2  ;;  %v902_v33 = vld [vmem:[%s1550_s4] sm:$0xff] }
 0x36b   : > { %1066 = vset.pattern.permute.xlu1 %v1120_v62  ;;  %1067 = vset.pattern.permute.xlu2 %v1121_v9 }
 0x36c   : > { %v309_v63 = vadd.f32 %v306_v7, %v291_v61  ;;  %v310_v4 = vadd.f32 %v1288_v23, %v292_v27  ;;  %799 = vperm.xlu1 %1066, %v1165_v0   ;;  %816 = vperm.xlu2 %1067, %v1165_v0   ;;  %v894_v7 = vld [vmem:[%s1549_s3] sm:$0xff] }
 0x36e   : > { %v327_v13 = vadd.f32 %v324_v3, %v309_v63  ;;  %v328_v18 = vadd.f32 %v1291_v29, %v310_v4 }
 0x370   : > { %v346_v58 = vadd.f32 %v1294_v34, %v328_v18  ;;  %v345_v1 = vadd.f32 %v342_v5, %v327_v13  ;;  %v688_v34 = vpop.permute.xlu2 %687 }
 0x372   : > { %v371_v23 = vadd.f32 %v1300_v39, %v346_v58  ;;  %v370_v35 = vadd.f32 %v1297_v37, %v345_v1 }
 0x374   : > { %1068 = vset.pattern.permute.xlu1 %v1122_v2  ;;  %1069 = vset.pattern.permute.xlu2 %v1123_v6  ;;  %v394_v8 = vadd.f32 %v1306_v44, %v371_v23  ;;  %v393_v10 = vadd.f32 %v1303_v41, %v370_v35 }
 0x375   : > { %835 = vperm.xlu1 %1068, %v1165_v0   ;;  %857 = vperm.xlu2 %1069, %v1165_v0  }
 0x376   : > { %v879_v11 = vadd.f32 %v1333_v42, %v394_v8  ;;  %v878_v29 = vadd.f32 %v1339_v46, %v393_v10 }
 0x37d   : > { %1070 = vset.pattern.permute.xlu1 %v1116_v28  ;;  %1071 = vset.pattern.permute.xlu2 %v1116_v28  ;;  %v690_v28 = vsel %vm365_vm3, %v1400_v22, %v688_v34 }
 0x37e   : > { %v694_v50 = vadd.f32 %v690_v28, %v1397_v19 }
 0x3a5   : > { %v708_v37 = vpop.permute.xlu2 %707 }
 0x3ad   : > { %v726_v39 = vpop.permute.xlu2 %725 }
 0x3ae   : > { %v729_v12 = vmul.f32 %v726_v39, %v1421_v47  ;;  %v728_v31 = vmul.f32 %v726_v39, %v1418_v43 }
 0x3b5   : > { %v741_v44 = vpop.permute.xlu2 %740 }
 0x3b6   : > { %v1470_v14 = vadd.f32 %v741_v44, %v729_v12 }
 0x3bd   : > { %v706_v41 = vpop.permute.xlu1 %705  ;;  %v766_v15 = vpop.permute.xlu2 %765 }
 0x3be   : > { %v711_v0 = vsel %vm388_vm4, %v706_v41, %v708_v37  ;;  %v768_v42 = vmul.f32 %v766_v15, %v1418_v43  ;;  %v769_v21 = vmul.f32 %v766_v15, %v1421_v47 }
 0x3bf   : > { %v715_v46 = vadd.f32 %v711_v0, %v1404_v26 }
 0x3c0   : > { %772 = vrot.lane.b32.xlu2 %v768_v42, %s1095_s27 }
 0x3c1   : > { %v1476_v17 = vadd.f32 %v878_v29, %v715_v46 }
 0x3c5   : > { %v710_v38 = vpop.permute.xlu1 %709 }
 0x3c6   : > { %v712_v24 = vsel %vm388_vm4, %v708_v37, %v710_v38  ;;  %v817_v26 = vpop.permute.xlu2 %816 }
 0x3c7   : > { %v716_v25 = vadd.f32 %v712_v24, %v694_v50  ;;  %v819_v32 = vmul.f32 %v817_v26, %v1418_v43  ;;  %v820_v51 = vmul.f32 %v817_v26, %v1421_v47 }
 0x3c8   : > { %791 = vrot.lane.b32.xlu2 %v786_v20, %s1096_s28 }
 0x3c9   : > { %v1485_v30 = vadd.f32 %v879_v11, %v716_v25 }
 0x3cd   : > { %v739_v36 = vpop.permute.xlu1 %738 }
 0x3ce   : > { %v742_v22 = vsel %vm251_vm5, %v739_v36, %v741_v44 }
 0x3cf   : > { %v745_v40 = vadd.f32 %v742_v22, %v728_v31  ;;  %v858_v59 = vpop.permute.xlu2 %857 }
 0x3d0   : > { %823 = vrot.lane.b32.xlu2 %v819_v32, %s1099_s6  ;;  %v861_v60 = vmul.f32 %v858_v59, %v1421_v47  ;;  %v860_v61 = vmul.f32 %v858_v59, %v1418_v43  ;;  %v862_v62 = vmul.f32 %v858_v59, %v832_v16 }
 0x3d5   : > { %v749_v19 = vpop.permute.xlu1 %748 }
 0x3d6   : > { %v751_v48 = vmul.f32 %v749_v19, %v1418_v43  ;;  %v752_v49 = vmul.f32 %v749_v19, %v1421_v47 }
 0x3d8   : > { %757 = vrot.lane.b32.xlu1 %v752_v49, %s1094_s26  ;;  %755 = vrot.lane.b32.xlu0 %v751_v48, %s1094_s26 }
 0x3de   : > { %v800_v52 = vpop.permute.xlu1 %799 }
 0x3df   : > { %v802_v53 = vmul.f32 %v800_v52, %v1418_v43  ;;  %v803_v54 = vmul.f32 %v800_v52, %v1421_v47 }
 0x3e0   : > { %774 = vrot.lane.b32.xlu0 %v769_v21, %s1095_s27  ;;  %789 = vrot.lane.b32.xlu1 %v785_v45, %s1096_s28 }
 0x3e7   : > { %v836_v55 = vpop.permute.xlu1 %835 }
 0x3e8   : > { %806 = vrot.lane.b32.xlu0 %v802_v53, %s1098_s30  ;;  %808 = vrot.lane.b32.xlu1 %v803_v54, %s1098_s30  ;;  %v839_v56 = vmul.f32 %v836_v55, %v1421_v47  ;;  %v838_v57 = vmul.f32 %v836_v55, %v1418_v43  ;;  %v840_v27 = vmul.f32 %v836_v55, %v832_v16  ;;  %v884_v47 = vld [vmem:[%s1548_s2] sm:$0xff] }
 0x3ea   : > { %846 = vrot.lane.b32.xlu2 %v839_v56, %s1100_s7 }
 0x3f0   : > { %825 = vrot.lane.b32.xlu0 %v820_v51, %s1099_s6  ;;  %844 = vrot.lane.b32.xlu1 %v838_v57, %s1100_s7 }
 0x3f2   : > { %868 = vrot.lane.b32.xlu2 %v861_v60, %s1101_s8 }
 0x3f8   : > { %848 = vrot.lane.b32.xlu0 %v840_v27, %s1100_s7  ;;  %866 = vrot.lane.b32.xlu1 %v860_v61, %s1101_s8 }
 0x3fa   : > { %897 = vperm.xlu2 %1071, %v894_v7  }
 0x400   : > { %870 = vrot.lane.b32.xlu0 %v862_v62, %s1101_s8  ;;  %887 = vperm.xlu1 %1070, %v884_v47  }
 0x408   : > { %905 = vperm.xlu0 %1065, %v902_v33  }
 0x41a   : > { %v773_v43 = vpop.permute.xlu2 %772 }
 0x422   : > { %v792_v4 = vpop.permute.xlu2 %791 }
 0x42a   : > { %v824_v18 = vpop.permute.xlu2 %823 }
 0x444   : > { %v847_v6 = vpop.permute.xlu2 %846 }
 0x44a   : > { %v758_v9 = vpop.permute.xlu1 %757  ;;  %v756_v63 = vpop.permute.xlu0 %755 }
 0x44b   : > { %v759_v5 = vsel %vm269_vm0, %v756_v63, %v758_v9  ;;  %v763_v12 = vadd.f32 %v758_v9, %v1470_v14 }
 0x44c   : > { %v762_v35 = vadd.f32 %v759_v5, %v745_v40  ;;  %v869_v15 = vpop.permute.xlu2 %868 }
 0x452   : > { %v790_v3 = vpop.permute.xlu1 %789  ;;  %v775_v13 = vpop.permute.xlu0 %774 }
 0x453   : > { %v776_v23 = vsel %vm287_vm1, %v773_v43, %v775_v13  ;;  %v793_v8 = vsel %vm305_vm2, %v790_v3, %v792_v4  ;;  %v780_v41 = vadd.f32 %v775_v13, %v763_v12 }
 0x454   : > { %v779_v2 = vadd.f32 %v776_v23, %v762_v35  ;;  %v898_v45 = vpop.permute.xlu2 %897 }
 0x455   : > { %v797_v50 = vadd.f32 %v792_v4, %v780_v41 }
 0x456   : > { %v796_v11 = vadd.f32 %v793_v8, %v779_v2 }
 0x45a   : > { %v809_v58 = vpop.permute.xlu1 %808  ;;  %v807_v1 = vpop.permute.xlu0 %806 }
 0x45b   : > { %v810_v10 = vsel %vm323_vm6, %v807_v1, %v809_v58  ;;  %v814_v24 = vadd.f32 %v809_v58, %v797_v50 }
 0x45c   : > { %v813_v39 = vadd.f32 %v810_v10, %v796_v11 }
 0x462   : > { %v845_v29 = vpop.permute.xlu1 %844  ;;  %v826_v34 = vpop.permute.xlu0 %825 }
 0x463   : > { %v827_v37 = vsel %vm341_vm7, %v824_v18, %v826_v34  ;;  %v850_v0 = vsel %vm365_vm3, %v845_v29, %v847_v6  ;;  %v831_v31 = vadd.f32 %v826_v34, %v814_v24 }
 0x464   : > { %v830_v44 = vadd.f32 %v827_v37, %v813_v39 }
 0x466   : > { %v854_v46 = vadd.f32 %v850_v0, %v830_v44 }
 0x46a   : > { %v867_v42 = vpop.permute.xlu1 %866  ;;  %v849_v28 = vpop.permute.xlu0 %848 }
 0x46b   : > { %v872_v20 = vsel %vm388_vm4, %v867_v42, %v869_v15  ;;  %v851_v26 = vsel %vm365_vm3, %v847_v6, %v849_v28 }
 0x46c   : > { %v876_v38 = vadd.f32 %v872_v20, %v854_v46  ;;  %v855_v14 = vadd.f32 %v851_v26, %v831_v31 }
 0x46e   : > { %v882_v25 = vadd.f32 %v1476_v17, %v876_v38 }
 0x472   : > { %v888_v32 = vpop.permute.xlu1 %887  ;;  %v871_v36 = vpop.permute.xlu0 %870 }
 0x473   : > { %v890_v22 = vadd.f32 %v888_v32, %v882_v25  ;;  %v873_v40 = vsel %vm388_vm4, %v869_v15, %v871_v36 }
 0x474   : > { %v877_v19 = vadd.f32 %v873_v40, %v855_v14 }
 0x475   : > { %v892_v48 = vmax.f32 %v890_v22, 0.0 }
 0x476   : > { %v883_v49 = vadd.f32 %v1485_v30, %v877_v19 }
 0x477   : > { %v900_v52 = vmul.f32 %v898_v45, %v892_v48 }
 0x478   : > { %v891_v21 = vadd.f32 %v888_v32, %v883_v49 }
 0x47a   : > { %v893_v53 = vmax.f32 %v891_v21, 0.0  ;;  %v906_v17 = vpop.permute.xlu0 %905 }
 0x47b   : > { %v908_v54 = vadd.f32 %v906_v17, %v900_v52 }
 0x47c   : > { %v901_v55 = vmul.f32 %v898_v45, %v893_v53 }
 0x47d   : > { %910 = vst [vmem:[%s224_s20] sm:$0xff] %v908_v54 }
 0x47e   : > { %v909_v56 = vadd.f32 %v906_v17, %v901_v55 }
 0x480   : > { %911 = vst.msk [vmem:[%s224_s20 + $0x8] sm:$0xff] %vm341_vm7, %v909_v56 }
 0x481 PF: > { %s15_s18 = sadd.s32 1, %s1078_s18  }
 0x482   : > { %p12_p4 = scmp.ge.s32.totalorder %s15_s18, 4  }
 0x484   :  { %14 = sbr.rel (!%p12_p4) target bundleno = 1 (0x1), region = 73 }

// kernel: sepconv_forward.2
= control target key start
LH: loop header
LB: loop body
LE: loop exit
PB: predicated region body
PF: predicated region fallthrough
CT: control target
= control target key end

     0   :  { %s1118_s15 = smov 0   ;;  %s1499_s0 = inlined_call_operand.vmem [shape: f32[2,4,258], index: 0, kind: input, shape index: {}]   ;;  %s1500_s1 = inlined_call_operand.vmem [shape: f32[8,36], index: 1, kind: input, shape index: {}]   ;;  %s1501_s2 = inlined_call_operand.vmem [shape: f32[8,1], index: 2, kind: input, shape index: {}]   ;;  %s1502_s3 = inlined_call_operand.vmem [shape: f32[1,224], index: 3, kind: input, shape index: {}]   ;;  %s1503_s4 = inlined_call_operand.vmem [shape: f32[2,8,2], index: 4, kind: output, shape index: {}]  }
   0x1 LB: > { %s940_s16 = sadd.s32 4294967295, %s1047_s15   ;;  %p944_p0 = scmp.ge.s32.totalorder %s1047_s15, 1  ;;  %s1047_s15 = sphi %s1118_s15, %s14_s15  }
   0x2   : > { %p162_p1 = scmp.lt.s32.totalorder %s1047_s15, 3 }
   0x4   : > { %p163_p2 = pnand %p944_p0, %p162_p1 }
   0x5   : > { %p187_p3 = scmp.lt.s32.totalorder (!%p163_p2), %s940_s16, 1  ;;  %s1063_s23 = smov (!%p163_p2), 126  }
   0x6   : > { %166 = sbr.rel (%p163_p2) target bundleno = 1140 (0x474), region = 36  ;;  %s1064_s24 = smov (!%p163_p2), 112  }
   0x7   : > { %s1065_s25 = smov (!%p163_p2), 111   ;;  %s1066_s26 = smov (!%p163_p2), 127  }
   0x8   : > { %s1067_s27 = smov (!%p163_p2), 110   ;;  %s1068_s28 = smov (!%p163_p2), 96  }
   0x9   : > { %s1069_s29 = smov (!%p163_p2), 95   ;;  %s1070_s30 = smov (!%p163_p2), 94  }
   0xb   : > { %v1129_v0 = vld [vmem:[%s1500_s1] sm:$0xff]  ;;  %v1049_v1 = vmov 1   ;;  %v1050_v2 = vmov 2   ;;  %v1051_v3 = vmov 11   ;;  %v1052_v4 = vmov 3   ;;  %s1505_s16 = smov (!%p187_p3, %s940_s16), 1 }
   0xc   : > { %1005 = vset.pattern.permute.xlu0 %v1049_v1  ;;  %1006 = vset.pattern.permute.xlu2 %v1050_v2  ;;  %v1053_v5 = vmov 12   ;;  %v1054_v6 = vmov 8   ;;  %v1055_v7 = vmov 4   ;;  %v1056_v8 = vmov 13   ;;  %s952_s19 = smul.u32 12, %s1505_s16  ;;  %s946_s9 = sshll.u32 %s1505_s16, 3 }
   0xd   : > { %211 = vperm.xlu0 %1005, %v1129_v0   ;;  %229 = vperm.xlu2 %1006, %v1129_v0   ;;  %v1057_v9 = vmov 10   ;;  %v1058_v10 = vmov 5   ;;  %v1059_v11 = vmov 14   ;;  %v1060_v12 = vmov 6   ;;  %s195_s12 = scalar_lea.vmem %s1503_s4, %s946_s9 }
   0xe   : > { %1015 = vset.pattern.permute.xlu1 %v1051_v3  ;;  %v1061_v13 = vmov 7   ;;  %s1154_s22 = scalar_lea.vmem %s1499_s0, %s952_s19  ;;  %v1062_v15 = vmov 9   ;;  %v1071_v57 = vmov 15   ;;  %v1072_v2 = vmov 16  }
   0xf   : > { %397 = vperm.xlu1 %1015, %v1129_v0   ;;  %v1157_v14 = vld [vmem:[%s1154_s22] ss:$4 sm:$0x7]  ;;  %v1184_v35 = vld [vmem:[%s1154_s22 + $0x1] ss:$4 sm:$0x7] }
  0x10   : > { %v1161_v16 = vperm.slane %v1157_v14, 0  ;;  %v1173_v27 = vperm.slane %v1157_v14, 1  ;;  %v318_v32 = vperm.slane %v1157_v14, 2  ;;  %v1189_v38 = vperm.slane %v1184_v35, 1 }
  0x11   : > { %v1206_v50 = vperm.slane %v1184_v35, 0  ;;  %vm240_vm0 = vcmask 1031168   ;;  %vm258_vm1 = vcmask 916480   ;;  %vm276_vm2 = vcmask 908288  }
  0x12   : > { %vm336_vm3 = vcmask 777216   ;;  %vm359_vm4 = vcmask 769024   ;;  %vm222_vm5 = vcmask 1039360   ;;  %vm294_vm6 = vcmask 900096  }
  0x13   : > { %vm312_vm7 = vcmask 785408   ;;  %vm883_vm8 = vcmask 7168   ;;  %vm885_vm9 = vcmask 15360  }
  0x15   : > { %1007 = vset.pattern.permute.xlu2 %v1052_v4  ;;  %1012 = vset.pattern.permute.xlu0 %v1054_v6 }
  0x16   : > { %247 = vperm.xlu2 %1007, %v1129_v0   ;;  %344 = vperm.xlu0 %1012, %v1129_v0  }
  0x17   : > { %1016 = vset.pattern.permute.xlu1 %v1053_v5 }
  0x18   : > { %414 = vperm.xlu1 %1016, %v1129_v0  }
  0x1e   : > { %1008 = vset.pattern.permute.xlu2 %v1055_v7  ;;  %1014 = vset.pattern.permute.xlu0 %v1057_v9 }
  0x1f   : > { %265 = vperm.xlu2 %1008, %v1129_v0   ;;  %380 = vperm.xlu0 %1014, %v1129_v0  }
  0x20   : > { %1017 = vset.pattern.permute.xlu1 %v1056_v8 }
  0x21   : > { %431 = vperm.xlu1 %1017, %v1129_v0  }
  0x27   : > { %1009 = vset.pattern.permute.xlu2 %v1058_v10 }
  0x28   : > { %283 = vperm.xlu2 %1009, %v1129_v0  }
  0x29   : > { %1018 = vset.pattern.permute.xlu1 %v1059_v11 }
  0x2a   : > { %448 = vperm.xlu1 %1018, %v1129_v0  }
  0x30   : > { %1010 = vset.pattern.permute.xlu2 %v1060_v12 }
  0x31   : > { %301 = vperm.xlu2 %1010, %v1129_v0  }
  0x32   : > { %1019 = vset.pattern.permute.xlu1 %v1071_v57 }
  0x39   : > { %1011 = vset.pattern.permute.xlu2 %v1061_v13 }
  0x3a   : > { %321 = vperm.xlu2 %1011, %v1129_v0  }
  0x42   : > { %1013 = vset.pattern.permute.xlu2 %v1062_v15 }
  0x43   : > { %374 = vperm.xlu2 %1013, %v1129_v0  }
  0x67   : > { %v230_v17 = vpop.permute.xlu2 %229 }
  0x68   : > { %v232_v18 = vmul.f32 %v230_v17, %v1161_v16  ;;  %v233_v31 = vmul.f32 %v230_v17, %v1173_v27 }
  0x6a   : > { %236 = vrot.lane.b32.xlu2 %v232_v18, %s1063_s23 }
  0x70   : > { %v248_v19 = vpop.permute.xlu2 %247 }
  0x71   : > { %v250_v20 = vmul.f32 %v248_v19, %v1161_v16  ;;  %v251_v39 = vmul.f32 %v248_v19, %v1173_v27 }
  0x73   : > { %254 = vrot.lane.b32.xlu0 %v250_v20, %s1064_s24 }
  0x79   : > { %v266_v21 = vpop.permute.xlu2 %265 }
  0x7a   : > { %v268_v22 = vmul.f32 %v266_v21, %v1161_v16  ;;  %v269_v44 = vmul.f32 %v266_v21, %v1173_v27 }
  0x7c   : > { %272 = vrot.lane.b32.xlu0 %v268_v22, %s1065_s25 }
  0x7f   : > { %v212_v23 = vpop.permute.xlu0 %211 }
  0x80   : > { %v214_v24 = vmul.f32 %v212_v23, %v1161_v16  ;;  %v215_v28 = vmul.f32 %v212_v23, %v1173_v27 }
  0x81   : > { %v398_v33 = vpop.permute.xlu1 %397 }
  0x82   : > { %218 = vrot.lane.b32.xlu1 %v214_v24, %s1066_s26  ;;  %v284_v25 = vpop.permute.xlu2 %283  ;;  %v401_v41 = vmul.f32 %v398_v33, %v1189_v38  ;;  %v400_v51 = vmul.f32 %v398_v33, %v1206_v50 }
  0x83   : > { %v286_v26 = vmul.f32 %v284_v25, %v1161_v16  ;;  %v287_v49 = vmul.f32 %v284_v25, %v1173_v27 }
  0x85   : > { %290 = vrot.lane.b32.xlu0 %v286_v26, %s1067_s27 }
  0x88   : > { %v345_v40 = vpop.permute.xlu0 %344 }
  0x89   : > { %v348_v42 = vmul.f32 %v345_v40, %v1173_v27  ;;  %v347_v60 = vmul.f32 %v345_v40, %v1161_v16  ;;  %v349_v62 = vmul.f32 %v345_v40, %v318_v32 }
  0x8a   : > { %220 = vrot.lane.b32.xlu1 %v215_v28, %s1066_s26  ;;  %v415_v43 = vpop.permute.xlu1 %414 }
  0x8b   : > { %v302_v29 = vpop.permute.xlu2 %301  ;;  %v418_v46 = vmul.f32 %v415_v43, %v1189_v38  ;;  %v417_v55 = vmul.f32 %v415_v43, %v1206_v50 }
  0x8c   : > { %v304_v30 = vmul.f32 %v302_v29, %v1161_v16  ;;  %v305_v53 = vmul.f32 %v302_v29, %v1173_v27 }
  0x8e   : > { %308 = vrot.lane.b32.xlu0 %v304_v30, %s1068_s28 }
  0x91   : > { %v381_v45 = vpop.permute.xlu0 %380 }
  0x92   : > { %238 = vrot.lane.b32.xlu1 %v233_v31, %s1063_s23  ;;  %v384_v47 = vmul.f32 %v381_v45, %v1189_v38  ;;  %v383_v63 = vmul.f32 %v381_v45, %v1206_v50 }
  0x93   : > { %v432_v48 = vpop.permute.xlu1 %431 }
  0x94   : > { %v322_v34 = vpop.permute.xlu2 %321  ;;  %v435_v52 = vmul.f32 %v432_v48, %v1189_v38  ;;  %v434_v59 = vmul.f32 %v432_v48, %v1206_v50 }
  0x95   : > { %v324_v36 = vmul.f32 %v322_v34, %v1161_v16  ;;  %v326_v37 = vmul.f32 %v322_v34, %v318_v32  ;;  %v325_v58 = vmul.f32 %v322_v34, %v1173_v27 }
  0x97   : > { %330 = vrot.lane.b32.xlu0 %v324_v36, %s1069_s29  ;;  %334 = vrot.lane.b32.xlu2 %v326_v37, %s1069_s29 }
  0x9a   : > { %256 = vrot.lane.b32.xlu1 %v251_v39, %s1064_s24 }
  0x9c   : > { %v449_v54 = vpop.permute.xlu1 %448 }
  0x9d   : > { %v452_v56 = vmul.f32 %v449_v54, %v1189_v38  ;;  %v451_v61 = vmul.f32 %v449_v54, %v1206_v50  ;;  %v375_v1 = vpop.permute.xlu2 %374 }
  0x9e   : > { %v378_v12 = vmul.f32 %v375_v1, %v1189_v38  ;;  %v377_v45 = vmul.f32 %v375_v1, %v1206_v50 }
  0x9f   : > { %406 = vrot.lane.b32.xlu0 %v401_v41, %s1063_s23  ;;  %355 = vrot.lane.b32.xlu2 %v348_v42, %s1070_s30  ;;  %v1073_v42 = vmov 17  }
  0xa0   : > { %1021 = vset.pattern.permute.xlu2 %v1073_v42 }
  0xa2   : > { %274 = vrot.lane.b32.xlu1 %v269_v44, %s1065_s25 }
  0xa7   : > { %423 = vrot.lane.b32.xlu0 %v418_v46, %s1064_s24  ;;  %389 = vrot.lane.b32.xlu2 %v384_v47, %s1066_s26 }
  0xaa   : > { %292 = vrot.lane.b32.xlu1 %v287_v49, %s1067_s27 }
  0xaf   : > { %440 = vrot.lane.b32.xlu0 %v435_v52, %s1065_s25  ;;  %404 = vrot.lane.b32.xlu2 %v400_v51, %s1063_s23 }
  0xb2   : > { %310 = vrot.lane.b32.xlu1 %v305_v53, %s1068_s28 }
  0xb7   : > { %457 = vrot.lane.b32.xlu0 %v452_v56, %s1067_s27  ;;  %421 = vrot.lane.b32.xlu2 %v417_v55, %s1064_s24  ;;  %v481_v56 = vperm.slane %v1184_v35, 2 }
  0xba   : > { %332 = vrot.lane.b32.xlu1 %v325_v58, %s1069_s29 }
  0xbf   : > { %438 = vrot.lane.b32.xlu2 %v434_v59, %s1065_s25 }
  0xc2   : > { %353 = vrot.lane.b32.xlu1 %v347_v60, %s1070_s30 }
  0xc4   : > { %v1234_v4 = vpop.permute.xlu2 %236 }
  0xc7   : > { %455 = vrot.lane.b32.xlu2 %v451_v61, %s1067_s27 }
  0xca   : > { %357 = vrot.lane.b32.xlu1 %v349_v62, %s1070_s30  ;;  %v1074_v62 = vmov 19  }
  0xd2   : > { %387 = vrot.lane.b32.xlu1 %v383_v63, %s1066_s26 }
  0xda   : > { %465 = vperm.xlu1 %1019, %v1129_v0  }
  0xe2   : > { %1020 = vset.pattern.permute.xlu1 %v1072_v2 }
  0xe3   : > { %484 = vperm.xlu1 %1020, %v1129_v0  }
  0xe5   : > { %v1232_v3 = vpop.permute.xlu0 %254 }
  0xeb   : > { %1023 = vset.pattern.permute.xlu1 %v1074_v62 }
  0xee   : > { %v1236_v5 = vpop.permute.xlu0 %272 }
  0xf1   : > { %v335_v6 = vpop.permute.xlu2 %334 }
  0xf4   : > { %v1238_v7 = vpop.permute.xlu1 %218 }
  0xf7   : > { %v1240_v8 = vpop.permute.xlu0 %290 }
  0xf9   : > { %v356_v10 = vpop.permute.xlu2 %355 }
  0xfc   : > { %v1242_v9 = vpop.permute.xlu1 %220 }
 0x100   : > { %v1244_v11 = vpop.permute.xlu0 %308 }
 0x101   : > { %v390_v14 = vpop.permute.xlu2 %389 }
 0x102   : > { %v395_v15 = vadd.f32 %v390_v14, %v378_v12 }
 0x104   : > { %v1247_v13 = vpop.permute.xlu1 %238 }
 0x109   : > { %v331_v17 = vpop.permute.xlu0 %330  ;;  %v405_v19 = vpop.permute.xlu2 %404 }
 0x10c   : > { %v1249_v18 = vpop.permute.xlu1 %256 }
 0x111   : > { %v407_v20 = vpop.permute.xlu0 %406  ;;  %v422_v24 = vpop.permute.xlu2 %421 }
 0x112   : > { %v412_v21 = vadd.f32 %v407_v20, %v395_v15  ;;  %v408_v22 = vsel %vm240_vm0, %v405_v19, %v407_v20 }
 0x114   : > { %v1252_v23 = vpop.permute.xlu1 %274 }
 0x119   : > { %v424_v25 = vpop.permute.xlu0 %423  ;;  %v439_v30 = vpop.permute.xlu2 %438 }
 0x11a   : > { %v429_v26 = vadd.f32 %v424_v25, %v412_v21  ;;  %v425_v28 = vsel %vm258_vm1, %v422_v24, %v424_v25  ;;  %v1075_v25 = vmov 18  }
 0x11b   : > { %1022 = vset.pattern.permute.xlu0 %v1075_v25 }
 0x11c   : > { %v1255_v29 = vpop.permute.xlu1 %292 }
 0x121   : > { %v441_v31 = vpop.permute.xlu0 %440  ;;  %v456_v61 = vpop.permute.xlu2 %455 }
 0x122   : > { %v446_v32 = vadd.f32 %v441_v31, %v429_v26  ;;  %v442_v33 = vsel %vm276_vm2, %v439_v30, %v441_v31  ;;  %v1076_v26 = vmov 20  }
 0x124   : > { %v1258_v34 = vpop.permute.xlu1 %310 }
 0x129   : > { %v458_v35 = vpop.permute.xlu0 %457 }
 0x12a   : > { %v459_v15 = vsel %vm294_vm6, %v456_v61, %v458_v35 }
 0x12c   : > { %v333_v36 = vpop.permute.xlu1 %332 }
 0x12d   : > { %v1261_v37 = vsel %vm336_vm3, %v331_v17, %v333_v36  ;;  %v1264_v39 = vsel %vm336_vm3, %v333_v36, %v335_v6 }
 0x134   : > { %v354_v40 = vpop.permute.xlu1 %353 }
 0x135   : > { %v1267_v41 = vsel %vm359_vm4, %v354_v40, %v356_v10 }
 0x13c   : > { %v358_v43 = vpop.permute.xlu1 %357 }
 0x13d   : > { %v1270_v44 = vsel %vm359_vm4, %v356_v10, %v358_v43 }
 0x144   : > { %v388_v46 = vpop.permute.xlu1 %387 }
 0x145   : > { %v391_v47 = vsel %vm222_vm5, %v388_v46, %v390_v14  ;;  %v463_v14 = vadd.f32 %v458_v35, %v446_v32  ;;  %v1082_v35 = vmov 28  }
 0x146   : > { %v394_v48 = vadd.f32 %v391_v47, %v377_v45  ;;  %v1301_v45 = vld [vmem:[%s1154_s22 + $0x2] ss:$4 sm:$0x7] }
 0x147   : > { %v1306_v47 = vperm.slane %v1301_v45, 0 }
 0x148   : > { %v411_v49 = vadd.f32 %v408_v22, %v394_v48  ;;  %v1309_v48 = vperm.slane %v1301_v45, 1 }
 0x14a   : > { %v428_v51 = vadd.f32 %v425_v28, %v411_v49 }
 0x14c   : > { %v445_v52 = vadd.f32 %v442_v33, %v428_v51  ;;  %v466_v53 = vpop.permute.xlu1 %465 }
 0x14d   : > { %v468_v54 = vmul.f32 %v466_v53, %v1206_v50  ;;  %v469_v55 = vmul.f32 %v466_v53, %v1189_v38  ;;  %v1077_v53 = vmov 21  }
 0x14e   : > { %v462_v17 = vadd.f32 %v459_v15, %v445_v52 }
 0x14f   : > { %474 = vrot.lane.b32.xlu0 %v469_v55, %s1068_s28  ;;  %472 = vrot.lane.b32.xlu2 %v468_v54, %s1068_s28  ;;  %v1078_v54 = vmov 22   ;;  %v1079_v55 = vmov 23  }
 0x155   : > { %v485_v57 = vpop.permute.xlu1 %484 }
 0x156   : > { %v487_v58 = vmul.f32 %v485_v57, %v1206_v50  ;;  %v488_v59 = vmul.f32 %v485_v57, %v1189_v38  ;;  %v489_v60 = vmul.f32 %v485_v57, %v481_v56  ;;  %v1081_v57 = vmov 25  }
 0x158   : > { %497 = vrot.lane.b32.xlu1 %v489_v60, %s1069_s29  ;;  %495 = vrot.lane.b32.xlu0 %v488_v59, %s1069_s29 }
 0x159   : > { %493 = vrot.lane.b32.xlu2 %v487_v58, %s1069_s29 }
 0x161   : > { %506 = vperm.xlu2 %1021, %v1129_v0  }
 0x169   : > { %1024 = vset.pattern.permute.xlu2 %v1076_v26  ;;  %v1086_v26 = vmov 33  }
 0x1a9   : > { %v473_v63 = vpop.permute.xlu2 %472 }
 0x1b3   : > { %v494_v1 = vpop.permute.xlu2 %493 }
 0x1bb   : > { %v507_v2 = vpop.permute.xlu2 %506 }
 0x1bc   : > { %v509_v6 = vmul.f32 %v507_v2, %v1206_v50  ;;  %v510_v10 = vmul.f32 %v507_v2, %v1189_v38  ;;  %v511_v12 = vmul.f32 %v507_v2, %v481_v56  ;;  %v1080_v56 = vmov 24  }
 0x1bd   : > { %v1083_v2 = vmov 30  }
 0x1be   : > { %519 = vrot.lane.b32.xlu2 %v511_v12, %s1070_s30  ;;  %517 = vrot.lane.b32.xlu1 %v510_v10, %s1070_s30  ;;  %v1084_v10 = vmov 29  }
 0x1bf   : > { %515 = vrot.lane.b32.xlu0 %v509_v6, %s1070_s30 }
 0x1c1   : > { %v475_v19 = vpop.permute.xlu0 %474 }
 0x1c2   : > { %v476_v20 = vsel %vm312_vm7, %v473_v63, %v475_v19  ;;  %v480_v21 = vadd.f32 %v475_v19, %v463_v14 }
 0x1c3   : > { %v479_v50 = vadd.f32 %v476_v20, %v462_v17 }
 0x1c6   : > { %541 = vperm.xlu1 %1023, %v1129_v0  }
 0x1c7   : > { %535 = vperm.xlu0 %1022, %v1129_v0  }
 0x1ca   : > { %v496_v38 = vpop.permute.xlu0 %495  ;;  %v498_v28 = vpop.permute.xlu1 %497 }
 0x1cb   : > { %v499_v22 = vsel %vm336_vm3, %v494_v1, %v496_v38  ;;  %v500_v30 = vsel %vm336_vm3, %v496_v38, %v498_v28  ;;  %v1085_v38 = vmov 31   ;;  %v1087_v28 = vmov 26  }
 0x1cc   : > { %v503_v24 = vadd.f32 %v499_v22, %v479_v50  ;;  %v504_v31 = vadd.f32 %v500_v30, %v480_v21  ;;  %v1088_v30 = vmov 32  }
 0x1ce   : > { %1032 = vset.pattern.permute.xlu1 %v1083_v2 }
 0x1cf   : > { %1031 = vset.pattern.permute.xlu0 %v1084_v10 }
 0x218   : > { %v520_v32 = vpop.permute.xlu2 %519 }
 0x230   : > { %v518_v33 = vpop.permute.xlu1 %517 }
 0x231   : > { %v522_v36 = vsel %vm359_vm4, %v518_v33, %v520_v32  ;;  %v516_v40 = vpop.permute.xlu0 %515  ;;  %v1090_v32 = vmov 34  }
 0x232   : > { %v1297_v42 = vadd.f32 %v522_v36, %v504_v31  ;;  %v521_v43 = vsel %vm359_vm4, %v516_v40, %v518_v33  ;;  %v1089_v31 = vmov 0   ;;  %v1091_v33 = vmov 35   ;;  %v1362_v36 = vld [vmem:[%s1154_s22 + $0x3] ss:$4 sm:$0x7] }
 0x233   : > { %v1303_v46 = vadd.f32 %v521_v43, %v503_v24  ;;  %v1365_v40 = vperm.slane %v1362_v36, 0  ;;  %v1368_v43 = vperm.slane %v1362_v36, 1 }
 0x238   : > { %v542_v49 = vpop.permute.xlu1 %541 }
 0x239   : > { %v544_v51 = vmul.f32 %v542_v49, %v1306_v47  ;;  %v545_v52 = vmul.f32 %v542_v49, %v1309_v48 }
 0x23b   : > { %550 = vrot.lane.b32.xlu1 %v545_v52, %s1066_s26  ;;  %548 = vrot.lane.b32.xlu2 %v544_v51, %s1066_s26  ;;  %v536_v51 = vpop.permute.xlu0 %535 }
 0x243   : > { %558 = vperm.xlu2 %1024, %v1129_v0  }
 0x24b   : > { %1025 = vset.pattern.permute.xlu2 %v1077_v53 }
 0x24c   : > { %575 = vperm.xlu2 %1025, %v1129_v0  }
 0x254   : > { %1026 = vset.pattern.permute.xlu2 %v1078_v54 }
 0x255   : > { %592 = vperm.xlu2 %1026, %v1129_v0  }
 0x25d   : > { %1027 = vset.pattern.permute.xlu2 %v1079_v55  ;;  %v538_v55 = vmul.f32 %v536_v51, %v1306_v47 }
 0x25e   : > { %609 = vperm.xlu2 %1027, %v1129_v0  }
 0x266   : > { %1028 = vset.pattern.permute.xlu2 %v1080_v56  ;;  %v1092_v56 = vmov 27  }
 0x267   : > { %626 = vperm.xlu2 %1028, %v1129_v0  }
 0x26f   : > { %1029 = vset.pattern.permute.xlu2 %v1081_v57 }
 0x270   : > { %645 = vperm.xlu2 %1029, %v1129_v0  }
 0x278   : > { %1030 = vset.pattern.permute.xlu2 %v1082_v35 }
 0x279   : > { %702 = vperm.xlu2 %1030, %v1129_v0  }
 0x281   : > { %1033 = vset.pattern.permute.xlu2 %v1085_v38 }
 0x282   : > { %753 = vperm.xlu2 %1033, %v1129_v0  }
 0x28a   : > { %1035 = vset.pattern.permute.xlu2 %v1086_v26 }
 0x28b   : > { %787 = vperm.xlu2 %1035, %v1129_v0  }
 0x293   : > { %1039 = vset.pattern.permute.xlu2 %v1091_v33 }
 0x294   : > { %828 = vperm.xlu2 %1039, %v1129_v0  }
 0x295   : > { %v1321_v58 = vpop.permute.xlu2 %548 }
 0x29d   : > { %v559_v59 = vpop.permute.xlu2 %558 }
 0x29e   : > { %v561_v60 = vmul.f32 %v559_v59, %v1306_v47  ;;  %v562_v61 = vmul.f32 %v559_v59, %v1309_v48 }
 0x2a0   : > { %567 = vrot.lane.b32.xlu1 %v562_v61, %s1063_s23  ;;  %565 = vrot.lane.b32.xlu0 %v561_v60, %s1063_s23 }
 0x2a6   : > { %v576_v62 = vpop.permute.xlu2 %575 }
 0x2a7   : > { %v578_v63 = vmul.f32 %v576_v62, %v1306_v47  ;;  %v579_v1 = vmul.f32 %v576_v62, %v1309_v48 }
 0x2a9   : > { %584 = vrot.lane.b32.xlu1 %v579_v1, %s1064_s24  ;;  %582 = vrot.lane.b32.xlu0 %v578_v63, %s1064_s24  ;;  %v539_v63 = vmul.f32 %v536_v51, %v1309_v48 }
 0x2ad   : > { %v551_v52 = vpop.permute.xlu1 %550 }
 0x2ae   : > { %v552_v57 = vsel %vm222_vm5, %v1321_v58, %v551_v52  ;;  %v556_v35 = vadd.f32 %v551_v52, %v539_v63 }
 0x2af   : > { %v593_v6 = vpop.permute.xlu2 %592  ;;  %v555_v59 = vadd.f32 %v552_v57, %v538_v55 }
 0x2b0   : > { %v595_v12 = vmul.f32 %v593_v6, %v1306_v47  ;;  %v596_v14 = vmul.f32 %v593_v6, %v1309_v48 }
 0x2b2   : > { %601 = vrot.lane.b32.xlu1 %v596_v14, %s1065_s25  ;;  %599 = vrot.lane.b32.xlu0 %v595_v12, %s1065_s25 }
 0x2b8   : > { %v610_v15 = vpop.permute.xlu2 %609 }
 0x2b9   : > { %v612_v17 = vmul.f32 %v610_v15, %v1306_v47  ;;  %v613_v19 = vmul.f32 %v610_v15, %v1309_v48 }
 0x2bb   : > { %618 = vrot.lane.b32.xlu1 %v613_v19, %s1067_s27  ;;  %616 = vrot.lane.b32.xlu0 %v612_v17, %s1067_s27 }
 0x2c1   : > { %v627_v20 = vpop.permute.xlu2 %626 }
 0x2c2   : > { %v629_v21 = vmul.f32 %v627_v20, %v1306_v47  ;;  %v630_v50 = vmul.f32 %v627_v20, %v1309_v48 }
 0x2c4   : > { %635 = vrot.lane.b32.xlu1 %v630_v50, %s1068_s28  ;;  %633 = vrot.lane.b32.xlu0 %v629_v21, %s1068_s28 }
 0x2ca   : > { %v1345_v22 = vpop.permute.xlu2 %645 }
 0x2cb   : > { %v648_v24 = vmul.f32 %v1345_v22, %v1306_v47  ;;  %v649_v25 = vmul.f32 %v1345_v22, %v1309_v48 }
 0x2cd   : > { %656 = vrot.lane.b32.xlu1 %v649_v25, %s1069_s29  ;;  %654 = vrot.lane.b32.xlu0 %v648_v24, %s1069_s29 }
 0x2d3   : > { %v703_v49 = vpop.permute.xlu2 %702 }
 0x2d4   : > { %v705_v53 = vmul.f32 %v703_v49, %v1365_v40  ;;  %v706_v54 = vmul.f32 %v703_v49, %v1368_v43 }
 0x2d5   : > { %736 = vperm.xlu1 %1032, %v1129_v0   ;;  %719 = vperm.xlu0 %1031, %v1129_v0  }
 0x2d6   : > { %709 = vrot.lane.b32.xlu2 %v705_v53, %s1066_s26 }
 0x2dd   : > { %1036 = vset.pattern.permute.xlu0 %v1087_v28  ;;  %1034 = vset.pattern.permute.xlu1 %v1088_v30 }
 0x2de   : > { %667 = vperm.xlu0 %1036, %v1129_v0   ;;  %770 = vperm.xlu1 %1034, %v1129_v0  }
 0x2e6   : > { %1037 = vset.pattern.permute.xlu0 %v1089_v31  ;;  %1038 = vset.pattern.permute.xlu1 %v1090_v32 }
 0x2e7   : > { %205 = vperm.xlu0 %1037, %v1129_v0   ;;  %806 = vperm.xlu1 %1038, %v1129_v0  }
 0x2ef   : > { %711 = vrot.lane.b32.xlu0 %v706_v54, %s1066_s26  ;;  %1040 = vset.pattern.permute.xlu1 %v1092_v56 }
 0x2f0   : > { %696 = vperm.xlu1 %1040, %v1129_v0  }
 0x312   : > { %v568_v60 = vpop.permute.xlu1 %567  ;;  %v566_v61 = vpop.permute.xlu0 %565 }
 0x313   : > { %v569_v62 = vsel %vm240_vm0, %v566_v61, %v568_v60  ;;  %v573_v2 = vadd.f32 %v568_v60, %v556_v35  ;;  %v642_v35 = vperm.slane %v1301_v45, 2 }
 0x314   : > { %v572_v1 = vadd.f32 %v569_v62, %v555_v59  ;;  %v754_v59 = vpop.permute.xlu2 %753 }
 0x315   : > { %v756_v60 = vmul.f32 %v754_v59, %v1365_v40  ;;  %v757_v61 = vmul.f32 %v754_v59, %v1368_v43 }
 0x31b   : > { %v585_v6 = vpop.permute.xlu1 %584  ;;  %v583_v10 = vpop.permute.xlu0 %582 }
 0x31c   : > { %v590_v12 = vadd.f32 %v585_v6, %v573_v2  ;;  %v586_v14 = vsel %vm258_vm1, %v583_v10, %v585_v6  ;;  %v650_v10 = vmul.f32 %v1345_v22, %v642_v35  ;;  %v788_v45 = vpop.permute.xlu2 %787 }
 0x31d   : > { %v589_v15 = vadd.f32 %v586_v14, %v572_v1 }
 0x324   : > { %v602_v17 = vpop.permute.xlu1 %601  ;;  %v600_v58 = vpop.permute.xlu0 %599 }
 0x325   : > { %v607_v19 = vadd.f32 %v602_v17, %v590_v12  ;;  %v603_v0 = vsel %vm276_vm2, %v600_v58, %v602_v17  ;;  %v223_v17 = vsel %vm222_vm5, %v1238_v7, %v1242_v9  ;;  %v259_v7 = vsel %vm258_vm1, %v1232_v3, %v1249_v18 }
 0x326   : > { %v606_v20 = vadd.f32 %v603_v0, %v589_v15  ;;  %v295_v3 = vsel %vm294_vm6, %v1240_v8, %v1255_v29 }
 0x32d   : > { %v619_v21 = vpop.permute.xlu1 %618  ;;  %v617_v50 = vpop.permute.xlu0 %616 }
 0x32e   : > { %v624_v38 = vadd.f32 %v619_v21, %v607_v19  ;;  %v620_v24 = vsel %vm294_vm6, %v617_v50, %v619_v21  ;;  %v790_v21 = vmul.f32 %v788_v45, %v1365_v40 }
 0x32f   : > { %v623_v25 = vadd.f32 %v620_v24, %v606_v20  ;;  %v791_v20 = vmul.f32 %v788_v45, %v1368_v43 }
 0x336   : > { %v636_v26 = vpop.permute.xlu1 %635  ;;  %v634_v28 = vpop.permute.xlu0 %633 }
 0x337   : > { %v1383_v30 = vadd.f32 %v636_v26, %v624_v38  ;;  %v637_v31 = vsel %vm312_vm7, %v634_v28, %v636_v26 }
 0x338   : > { %v640_v32 = vadd.f32 %v637_v31, %v623_v25 }
 0x33f   : > { %v1386_v33 = vpop.permute.xlu1 %656  ;;  %v655_v49 = vpop.permute.xlu0 %654 }
 0x340   : > { %v660_v51 = vsel %vm336_vm3, %v655_v49, %v1386_v33 }
 0x341   : > { %v1390_v52 = vadd.f32 %v660_v51, %v640_v32 }
 0x347   : > { %v737_v53 = vpop.permute.xlu1 %736  ;;  %v720_v54 = vpop.permute.xlu0 %719 }
 0x348   : > { %v739_v55 = vmul.f32 %v737_v53, %v1365_v40  ;;  %v722_v56 = vmul.f32 %v720_v54, %v1365_v40  ;;  %v723_v57 = vmul.f32 %v720_v54, %v1368_v43  ;;  %v740_v63 = vmul.f32 %v737_v53, %v1368_v43 }
 0x34a   : > { %743 = vrot.lane.b32.xlu0 %v739_v55, %s1064_s24  ;;  %728 = vrot.lane.b32.xlu2 %v723_v57, %s1063_s23 }
 0x34b   : > { %726 = vrot.lane.b32.xlu1 %v722_v56, %s1063_s23 }
 0x350   : > { %v668_v62 = vpop.permute.xlu0 %667  ;;  %v771_v1 = vpop.permute.xlu1 %770 }
 0x351   : > { %v774_v2 = vmul.f32 %v771_v1, %v1368_v43  ;;  %v773_v6 = vmul.f32 %v771_v1, %v1365_v40  ;;  %v672_v32 = vmul.f32 %v668_v62, %v642_v35  ;;  %v670_v53 = vmul.f32 %v668_v62, %v1306_v47 }
 0x352   : > { %762 = vrot.lane.b32.xlu0 %v757_v61, %s1065_s25  ;;  %760 = vrot.lane.b32.xlu2 %v756_v60, %s1065_s25 }
 0x353   : > { %745 = vrot.lane.b32.xlu1 %v740_v63, %s1064_s24 }
 0x359   : > { %v206_v12 = vpop.permute.xlu0 %205 }
 0x35a   : > { %v208_v14 = vmul.f32 %v206_v12, %v1161_v16  ;;  %v209_v15 = vmul.f32 %v206_v12, %v1173_v27  ;;  %658 = vrot.lane.b32.xlu0 %v650_v10, %s1069_s29  ;;  %779 = vrot.lane.b32.xlu2 %v774_v2, %s1067_s27  ;;  %v241_v16 = vsel %vm240_vm0, %v1234_v4, %v1247_v13 }
 0x35b   : > { %777 = vrot.lane.b32.xlu1 %v773_v6, %s1067_s27  ;;  %v671_v27 = vmul.f32 %v668_v62, %v1309_v48  ;;  %v277_v4 = vsel %vm276_vm2, %v1236_v5, %v1252_v23  ;;  %v313_v5 = vsel %vm312_vm7, %v1244_v11, %v1258_v34  ;;  %v829_v11 = vpop.permute.xlu2 %828 }
 0x35c   : > { %v226_v58 = vadd.f32 %v223_v17, %v208_v14  ;;  %v227_v19 = vadd.f32 %v1242_v9, %v209_v15 }
 0x35e   : > { %v244_v22 = vadd.f32 %v241_v16, %v226_v58  ;;  %v245_v0 = vadd.f32 %v1247_v13, %v227_v19  ;;  %v803_v13 = vperm.slane %v1362_v36, 2 }
 0x360   : > { %v262_v50 = vadd.f32 %v259_v7, %v244_v22  ;;  %v263_v9 = vadd.f32 %v1249_v18, %v245_v0  ;;  %v807_v18 = vpop.permute.xlu1 %806 }
 0x361   : > { %v811_v26 = vmul.f32 %v807_v18, %v803_v13  ;;  %v712_v55 = vpop.permute.xlu0 %711 }
 0x362   : > { %v280_v38 = vadd.f32 %v277_v4, %v262_v50  ;;  %v281_v48 = vadd.f32 %v1252_v23, %v263_v9  ;;  %796 = vrot.lane.b32.xlu2 %v791_v20, %s1068_s28  ;;  %678 = vrot.lane.b32.xlu0 %v671_v27, %s1070_s30  ;;  %v810_v23 = vmul.f32 %v807_v18, %v1368_v43 }
 0x363   : > { %794 = vrot.lane.b32.xlu1 %v790_v21, %s1068_s28 }
 0x364   : > { %v298_v24 = vadd.f32 %v295_v3, %v280_v38  ;;  %v299_v25 = vadd.f32 %v1255_v29, %v281_v48 }
 0x366   : > { %v316_v28 = vadd.f32 %v313_v5, %v298_v24  ;;  %v317_v36 = vadd.f32 %v1258_v34, %v299_v25 }
 0x368   : > { %v341_v31 = vadd.f32 %v1261_v37, %v316_v28  ;;  %v342_v8 = vadd.f32 %v1264_v39, %v317_v36  ;;  %v832_v37 = vmul.f32 %v829_v11, %v1368_v43  ;;  %v809_v39 = vmul.f32 %v807_v18, %v1365_v40  ;;  %v697_v56 = vpop.permute.xlu1 %696 }
 0x369   : > { %v699_v6 = vmul.f32 %v697_v56, %v1365_v40  ;;  %v700_v14 = vmul.f32 %v697_v56, %v1368_v43 }
 0x36a   : > { %817 = vrot.lane.b32.xlu2 %v810_v23, %s1069_s29  ;;  %819 = vrot.lane.b32.xlu0 %v811_v26, %s1069_s29  ;;  %v364_v29 = vadd.f32 %v1267_v41, %v341_v31  ;;  %v365_v49 = vadd.f32 %v1270_v44, %v342_v8  ;;  %v855_v41 = vld [vmem:[%s1501_s2] sm:$0xff]  ;;  %v831_v44 = vmul.f32 %v829_v11, %v1365_v40 }
 0x36b   : > { %680 = vrot.lane.b32.xlu1 %v672_v32, %s1070_s30  ;;  %v717_v19 = vadd.f32 %v712_v55, %v700_v14 }
 0x36c   : > { %v1453_v51 = vadd.f32 %v1303_v46, %v364_v29  ;;  %v850_v34 = vadd.f32 %v1297_v42, %v365_v49  ;;  %v833_v46 = vmul.f32 %v829_v11, %v803_v13  ;;  %v710_v42 = vpop.permute.xlu2 %709 }
 0x36d   : > { %v713_v10 = vsel %vm222_vm5, %v710_v42, %v712_v55  ;;  %v865_v42 = vld [vmem:[%s1502_s3] sm:$0x3] }
 0x36e   : > { %v716_v45 = vadd.f32 %v713_v10, %v699_v6 }
 0x372   : > { %815 = vrot.lane.b32.xlu2 %v809_v39, %s1069_s29  ;;  %839 = vrot.lane.b32.xlu0 %v832_v37, %s1070_s30 }
 0x373   : > { %676 = vrot.lane.b32.xlu1 %v670_v53, %s1070_s30 }
 0x37a   : > { %837 = vrot.lane.b32.xlu2 %v831_v44, %s1070_s30  ;;  %858 = vperm.xlu0 %1037, %v855_v41  }
 0x37b   : > { %841 = vrot.lane.b32.xlu1 %v833_v46, %s1070_s30 }
 0x3a4   : > { %v729_v47 = vpop.permute.xlu2 %728 }
 0x3a5   : > { %v734_v40 = vadd.f32 %v729_v47, %v717_v19 }
 0x3ac   : > { %v761_v54 = vpop.permute.xlu2 %760 }
 0x3b4   : > { %v780_v59 = vpop.permute.xlu2 %779 }
 0x3bc   : > { %v744_v57 = vpop.permute.xlu0 %743  ;;  %v797_v63 = vpop.permute.xlu2 %796 }
 0x3bd   : > { %v727_v60 = vpop.permute.xlu1 %726 }
 0x3be   : > { %v730_v17 = vsel %vm240_vm0, %v727_v60, %v729_v47  ;;  %v867_v47 = vperm.slane %v865_v42, 0 }
 0x3bf   : > { %v733_v16 = vadd.f32 %v730_v17, %v716_v45 }
 0x3c4   : > { %v763_v61 = vpop.permute.xlu0 %762  ;;  %v818_v2 = vpop.permute.xlu2 %817 }
 0x3c5   : > { %v746_v62 = vpop.permute.xlu1 %745  ;;  %v764_v43 = vsel %vm276_vm2, %v761_v54, %v763_v61 }
 0x3c6   : > { %v747_v58 = vsel %vm258_vm1, %v744_v57, %v746_v62  ;;  %v751_v4 = vadd.f32 %v746_v62, %v734_v40 }
 0x3c7   : > { %v750_v22 = vadd.f32 %v747_v58, %v733_v16 }
 0x3c8   : > { %v768_v18 = vadd.f32 %v763_v61, %v751_v4 }
 0x3c9   : > { %v767_v38 = vadd.f32 %v764_v43, %v750_v22 }
 0x3ca   : > { %v785_v36 = vadd.f32 %v780_v59, %v768_v18 }
 0x3cc   : > { %v659_v1 = vpop.permute.xlu0 %658  ;;  %v816_v0 = vpop.permute.xlu2 %815  ;;  %v802_v11 = vadd.f32 %v797_v63, %v785_v36 }
 0x3cd   : > { %v778_v35 = vpop.permute.xlu1 %777  ;;  %v661_v27 = vsel %vm336_vm3, %v1386_v33, %v659_v1 }
 0x3ce   : > { %v665_v7 = vadd.f32 %v661_v27, %v1383_v30  ;;  %v781_v50 = vsel %vm294_vm6, %v778_v35, %v780_v59  ;;  %v821_v30 = vsel %vm336_vm3, %v816_v0, %v818_v2 }
 0x3cf   : > { %v784_v3 = vadd.f32 %v781_v50, %v767_v38 }
 0x3d4   : > { %v679_v12 = vpop.permute.xlu0 %678  ;;  %v838_v5 = vpop.permute.xlu2 %837 }
 0x3d5   : > { %v795_v15 = vpop.permute.xlu1 %794 }
 0x3d6   : > { %v798_v13 = vsel %vm312_vm7, %v795_v15, %v797_v63 }
 0x3d7   : > { %v801_v24 = vadd.f32 %v798_v13, %v784_v3 }
 0x3d9   : > { %v825_v8 = vadd.f32 %v821_v30, %v801_v24 }
 0x3dc   : > { %v820_v20 = vpop.permute.xlu0 %819 }
 0x3dd   : > { %v681_v21 = vpop.permute.xlu1 %680  ;;  %v822_v49 = vsel %vm336_vm3, %v818_v2, %v820_v20 }
 0x3de   : > { %v683_v9 = vsel %vm359_vm4, %v679_v12, %v681_v21  ;;  %v826_v39 = vadd.f32 %v822_v49, %v802_v11 }
 0x3df   : > { %v687_v48 = vadd.f32 %v683_v9, %v665_v7 }
 0x3e1   : > { %v852_v33 = vadd.f32 %v850_v34, %v687_v48 }
 0x3e4   : > { %v840_v25 = vpop.permute.xlu0 %839 }
 0x3e5   : > { %v677_v23 = vpop.permute.xlu1 %676  ;;  %v843_v28 = vsel %vm359_vm4, %v838_v5, %v840_v25 }
 0x3e6   : > { %v682_v26 = vsel %vm359_vm4, %v677_v23, %v679_v12  ;;  %v847_v32 = vadd.f32 %v843_v28, %v825_v8 }
 0x3e7   : > { %v686_v31 = vadd.f32 %v682_v26, %v1390_v52 }
 0x3e9   : > { %v851_v29 = vadd.f32 %v1453_v51, %v686_v31  ;;  %v868_v51 = vperm.slane %v865_v42, 1 }
 0x3eb   : > { %v853_v34 = vadd.f32 %v851_v29, %v847_v32 }
 0x3ec   : > { %v859_v37 = vpop.permute.xlu0 %858 }
 0x3ed   : > { %v842_v53 = vpop.permute.xlu1 %841  ;;  %v861_v44 = vadd.f32 %v859_v37, %v853_v34 }
 0x3ee   : > { %v844_v41 = vsel %vm359_vm4, %v840_v25, %v842_v53 }
 0x3ef   : > { %v848_v46 = vadd.f32 %v844_v41, %v826_v39  ;;  %v863_v54 = vmax.f32 %v861_v44, 0.0 }
 0x3f1   : > { %v854_v52 = vadd.f32 %v852_v33, %v848_v46  ;;  %v871_v57 = vmul.f32 %v867_v47, %v863_v54 }
 0x3f3   : > { %v862_v55 = vadd.f32 %v859_v37, %v854_v52  ;;  %v877_v63 = vmul.f32 %v871_v57, %v871_v57 }
 0x3f5   : > { %v864_v56 = vmax.f32 %v862_v55, 0.0 }
 0x3f7   : > { %v872_v59 = vmul.f32 %v868_v51, %v864_v56 }
 0x3f9   : > { %v873_v60 = vsel %vm312_vm7, %v872_v59, 0.0  ;;  %v878_v61 = vmul.f32 %v872_v59, %v872_v59 }
 0x3fa   : > { %v874_v62 = vadd.f32 %v873_v60, %v871_v57 }
 0x3fb   : > { %v879_v1 = vsel %vm312_vm7, %v878_v61, 0.0 }
 0x3fc   : > { %875 = vadd.xlane.f32.xlu1 %v874_v62  ;;  %v880_v35 = vadd.f32 %v879_v1, %v877_v63 }
 0x3fe   : > { %881 = vadd.xlane.f32.xlu2 %v880_v35 }
 0x46f   : > { %v876_v2 = vpop.xlane.xlu1 %875 }
 0x471   : > { %v882_v6 = vpop.xlane.xlu2 %881 }
 0x472   : > { %v884_v10 = vsel %vm883_vm8, %v876_v2, %v882_v6 }
 0x473   : > { %886 = vst.msk [vmem:[%s195_s12] sm:$0xff] %vm885_vm9, %v884_v10 }
 0x474 PF: > { %s14_s15 = sadd.s32 1, %s1047_s15  }
 0x475   : > { %p11_p4 = scmp.ge.s32.totalorder %s14_s15, 4  }
 0x477   :  { %13 = sbr.rel (!%p11_p4) target bundleno = 1 (0x1), region = 69 }

</bundles_post_ra>
